<compile_context>
chip_gen: v7x
topology: tpu7x:2x2x1
jax: 0.10.0
libtpu: 0.0.40
codegen_flags: <defaults>
</compile_context>

<pallas_src>
import functools
import math

import jax
import jax.numpy as jnp
from jax import lax
from jax.experimental import pallas as pl
from jax.experimental.pallas import tpu as pltpu

LN_EPS = 1e-12
MASK_FILL = -10000.0


# ----------------------------- helpers -----------------------------

def _tile(dim, target, align):
    """Largest tile <= target that divides `dim` and is `align`-aligned,
    falling back to the full dim (always a legal block shape)."""
    if dim <= target:
        return dim
    t = (target // align) * align
    while t >= align:
        if dim % t == 0:
            return t
        t -= align
    return dim


# ----------------------------- Pallas kernels -----------------------------

def _matmul_kernel(x_ref, w_ref, b_ref, o_ref, acc_ref, *, activation):
    """out = act(x @ w + b); grid = (Mt, Nt, Kt); f32 accumulator scratch."""
    @pl.when(pl.program_id(2) == 0)
    def _init():
        acc_ref[...] = jnp.zeros_like(acc_ref)

    acc_ref[...] += jnp.dot(x_ref[...], w_ref[...],
                            preferred_element_type=jnp.float32)

    @pl.when(pl.program_id(2) == pl.num_programs(2) - 1)
    def _finalize():
        y = acc_ref[...] + b_ref[...]
        if activation == "relu":
            y = jnp.maximum(y, 0.0)
        o_ref[...] = y.astype(o_ref.dtype)


def _matmul_add_ln_kernel(x_ref, w_ref, b_ref, r_ref, g_ref, bt_ref,
                          o_ref, acc_ref):
    """out = LayerNorm(x @ w + b + residual); grid = (Mt, Kt); N kept whole so
    the LayerNorm reduction sees the full feature dim."""
    @pl.when(pl.program_id(1) == 0)
    def _init():
        acc_ref[...] = jnp.zeros_like(acc_ref)

    acc_ref[...] += jnp.dot(x_ref[...], w_ref[...],
                            preferred_element_type=jnp.float32)

    @pl.when(pl.program_id(1) == pl.num_programs(1) - 1)
    def _finalize():
        y = acc_ref[...] + b_ref[...] + r_ref[...].astype(jnp.float32)
        mean = jnp.mean(y, axis=-1, keepdims=True)
        var = jnp.mean(jnp.square(y - mean), axis=-1, keepdims=True)
        inv = lax.rsqrt(var + LN_EPS)
        o_ref[...] = ((y - mean) * inv * g_ref[...] + bt_ref[...]
                      ).astype(o_ref.dtype)


def _attention_body(q, k, v, mask, n_head, out_dtype):
    """Scaled-dot-product attention with all heads folded along the feature
    dim.  q:(Sq,D)  k,v:(Sk,D)  mask:(Sq,Sk) float (0 -> masked).
    Per-head split happens in VMEM (static unrolled loop over heads; the
    contraction depth per head is d_k either way, so a batched einsum would
    not improve MXU fill)."""
    d_model = q.shape[-1]
    d_k = d_model // n_head
    scale = 1.0 / math.sqrt(d_k)
    outs = []
    for h in range(n_head):
        sl = slice(h * d_k, (h + 1) * d_k)
        s = jnp.dot(q[:, sl], k[:, sl].T,
                    preferred_element_type=jnp.float32) * scale
        s = jnp.where(mask == 0.0, MASK_FILL, s)
        s_max = jnp.max(s, axis=-1, keepdims=True)
        e = jnp.exp(s - s_max)
        p = e * pl.reciprocal(jnp.sum(e, axis=-1, keepdims=True), approx=True)
        outs.append(jnp.dot(p.astype(v.dtype), v[:, sl],
                            preferred_element_type=jnp.float32))
    return jnp.concatenate(outs, axis=-1).astype(out_dtype)


def _self_attn_kernel(qkv_ref, m_ref, o_ref, *, n_head, d_model):
    qkv = qkv_ref[0]                               # (S, 3*D) bf16
    q = qkv[:, :d_model]
    k = qkv[:, d_model:2 * d_model]
    v = qkv[:, 2 * d_model:]
    o_ref[0] = _attention_body(q, k, v, m_ref[0], n_head, o_ref.dtype)


def _cross_attn_kernel(q_ref, kv_ref, m_ref, o_ref, *, n_head, d_model):
    kv = kv_ref[0]                                 # (Sk, 2*D) bf16
    o_ref[0] = _attention_body(q_ref[0], kv[:, :d_model], kv[:, d_model:],
                               m_ref[0], n_head, o_ref.dtype)


# ----------------------------- kernel wrappers -----------------------------

def linear(x, w, b, *, activation=None, out_dtype=jnp.bfloat16,
           tm=256, tn=256, tk=512):
    """Tiled y = act(x @ w + b).  x:(M,K) bf16, w:(K,N) bf16, b:(1,N) f32."""
    M, K = x.shape
    N = w.shape[1]
    tm = _tile(M, tm, 8)
    tn = _tile(N, tn, 128)
    tk = _tile(K, tk, 128)      # 512-deep K tiles keep v5e's 4x128^2 MXU full
    grid = (M // tm, N // tn, K // tk)
    kern = functools.partial(_matmul_kernel, activation=activation)
    return pl.pallas_call(
        kern,
        out_shape=jax.ShapeDtypeStruct((M, N), out_dtype),
        grid=grid,
        in_specs=[
            pl.BlockSpec((tm, tk), lambda i, j, k: (i, k)),
            pl.BlockSpec((tk, tn), lambda i, j, k: (k, j)),
            pl.BlockSpec((1, tn), lambda i, j, k: (0, j)),
        ],
        out_specs=pl.BlockSpec((tm, tn), lambda i, j, k: (i, j)),
        scratch_shapes=[pltpu.VMEM((tm, tn), jnp.float32)],
        compiler_params=pltpu.CompilerParams(
            dimension_semantics=("parallel", "parallel", "arbitrary")),
    )(x, w, b)


def linear_add_layernorm(x, w, b, residual, gamma, beta, *,
                         out_dtype=jnp.bfloat16, tm=256, tk=512):
    """Tiled y = LayerNorm(x @ w + b + residual) fused in one kernel."""
    M, K = x.shape
    N = w.shape[1]
    tm = _tile(M, tm, 8)
    tk = _tile(K, tk, 128)
    grid = (M // tm, K // tk)
    return pl.pallas_call(
        _matmul_add_ln_kernel,
        out_shape=jax.ShapeDtypeStruct((M, N), out_dtype),
        grid=grid,
        in_specs=[
            pl.BlockSpec((tm, tk), lambda i, k: (i, k)),
            pl.BlockSpec((tk, N), lambda i, k: (k, 0)),
            pl.BlockSpec((1, N), lambda i, k: (0, 0)),
            pl.BlockSpec((tm, N), lambda i, k: (i, 0)),
            pl.BlockSpec((1, N), lambda i, k: (0, 0)),
            pl.BlockSpec((1, N), lambda i, k: (0, 0)),
        ],
        out_specs=pl.BlockSpec((tm, N), lambda i, k: (i, 0)),
        scratch_shapes=[pltpu.VMEM((tm, N), jnp.float32)],
        compiler_params=pltpu.CompilerParams(
            dimension_semantics=("parallel", "arbitrary")),
    )(x, w, b, residual, gamma, beta)


def self_attention(qkv, mask, n_head):
    """qkv:(B,S,3D) bf16 (fused Q|K|V), mask:(B,S,S) f32 -> (B,S,D) bf16."""
    B, S, three_d = qkv.shape
    d_model = three_d // 3
    kern = functools.partial(_self_attn_kernel, n_head=n_head, d_model=d_model)
    return pl.pallas_call(
        kern,
        out_shape=jax.ShapeDtypeStruct((B, S, d_model), qkv.dtype),
        grid=(B,),
        in_specs=[
            pl.BlockSpec((1, S, three_d), lambda b: (b, 0, 0)),
            pl.BlockSpec((1, S, S), lambda b: (b, 0, 0)),
        ],
        out_specs=pl.BlockSpec((1, S, d_model), lambda b: (b, 0, 0)),
        compiler_params=pltpu.CompilerParams(
            dimension_semantics=("parallel",)),
    )(qkv, mask)


def cross_attention(q, kv, mask, n_head):
    """q:(B,Sq,D), kv:(B,Sk,2D) (fused K|V), mask:(B,Sq,Sk) -> (B,Sq,D)."""
    B, Sq, d_model = q.shape
    Sk = kv.shape[1]
    kern = functools.partial(_cross_attn_kernel, n_head=n_head,
                             d_model=d_model)
    return pl.pallas_call(
        kern,
        out_shape=jax.ShapeDtypeStruct((B, Sq, d_model), q.dtype),
        grid=(B,),
        in_specs=[
            pl.BlockSpec((1, Sq, d_model), lambda b: (b, 0, 0)),
            pl.BlockSpec((1, Sk, 2 * d_model), lambda b: (b, 0, 0)),
            pl.BlockSpec((1, Sq, Sk), lambda b: (b, 0, 0)),
        ],
        out_specs=pl.BlockSpec((1, Sq, d_model), lambda b: (b, 0, 0)),
        compiler_params=pltpu.CompilerParams(
            dimension_semantics=("parallel",)),
    )(q, kv, mask)


# ----------------------------- decoder model -----------------------------

def decoder_layer(x, enc2d, trg_mask_b, src_mask_b, p, n_head):
    B, S, D = x.shape
    Sk = src_mask_b.shape[-1]
    x2d = x.reshape(B * S, D)

    # 1. masked self-attention: fused QKV projection -> attention ->
    #    output projection fused with add + LayerNorm.
    qkv = linear(x2d, p["w_qkv"], p["b_qkv"])
    attn = self_attention(qkv.reshape(B, S, 3 * D), trg_mask_b, n_head)
    x2d = linear_add_layernorm(attn.reshape(B * S, D), p["w_o1"], p["b_o1"],
                               x2d, p["ln1_g"], p["ln1_b"])

    # 2. encoder-decoder attention: Q projection + fused KV projection ->
    #    attention -> output projection fused with add + LayerNorm.
    q = linear(x2d, p["w_q2"], p["b_q2"])
    kv = linear(enc2d, p["w_kv2"], p["b_kv2"])
    attn = cross_attention(q.reshape(B, S, D), kv.reshape(B, Sk, 2 * D),
                           src_mask_b, n_head)
    x2d = linear_add_layernorm(attn.reshape(B * S, D), p["w_o2"], p["b_o2"],
                               x2d, p["ln2_g"], p["ln2_b"])

    # 3. position-wise FFN: linear+ReLU, then linear fused with add + LN.
    h = linear(x2d, p["ffn_w1"], p["ffn_b1"], activation="relu")
    x2d = linear_add_layernorm(h, p["ffn_w2"], p["ffn_b2"],
                               x2d, p["ln3_g"], p["ln3_b"])
    return x2d.reshape(B, S, D)


def sinusoidal_pe(max_len, d_model):
    pos = jnp.arange(max_len, dtype=jnp.float32)[:, None]
    two_i = jnp.arange(0, d_model, 2, dtype=jnp.float32)
    angle = pos / jnp.power(10000.0, two_i / d_model)
    pe = jnp.zeros((max_len, d_model), jnp.float32)
    pe = pe.at[:, 0::2].set(jnp.sin(angle))
    pe = pe.at[:, 1::2].set(jnp.cos(angle))
    return pe


def decoder_forward(trg, enc_src, trg_mask, src_mask, params, n_head,
                    vocab_size):
    B, S = trg.shape
    Sk = enc_src.shape[1]
    d_model = params["tok_emb"].shape[1]

    # TransformerEmbedding: token embedding (padding_idx=1) + sinusoidal PE,
    # dropout = identity.  (Gather + add is XLA glue; hot loops are kernels.)
    x = (params["tok_emb"][trg].astype(jnp.float32)
         + params["pos_emb"][:S][None, :, :]).astype(jnp.bfloat16)

    # Broadcast masks once to (B, Sq, Sk); all heads share them.
    # TODO(synk): masks are runtime inputs of the module (may encode padding),
    # so they are DMA'd per batch instead of regenerated via iota in-kernel.
    trg_mask_b = jnp.broadcast_to(trg_mask, (B, 1, S, S))[:, 0] \
        .astype(jnp.float32)
    src_mask_b = jnp.broadcast_to(src_mask, (B, 1, S, Sk))[:, 0] \
        .astype(jnp.float32)

    enc2d = enc_src.astype(jnp.bfloat16).reshape(B * Sk, d_model)

    for lp in params["layers"]:
        x = decoder_layer(x, enc2d, trg_mask_b, src_mask_b, lp, n_head)

    # Final vocab projection on a 128-padded vocab (lane-dense store), f32
    # logits, then slice back to the true vocab size.
    logits = linear(x.reshape(B * S, d_model), params["out_w"],
                    params["out_b"], out_dtype=jnp.float32, tn=512)
    return logits[:, :vocab_size].reshape(B, S, vocab_size)


# ----------------------------- parameter init -----------------------------

def init_params(key, dec_voc_size, max_len, d_model, ffn_hidden, n_layers):
    keys = iter(jax.random.split(key, 2 + n_layers * 7))

    def w(shape):
        return (jax.random.normal(next(keys), shape, jnp.float32) * 0.02
                ).astype(jnp.bfloat16)

    def b(n):
        return jnp.zeros((1, n), jnp.float32)

    def ones(n):
        return jnp.ones((1, n), jnp.float32)

    tok_emb = w((dec_voc_size, d_model))
    tok_emb = tok_emb.at[1].set(0.0)          # nn.Embedding padding_idx=1

    layers = []
    for _ in range(n_layers):
        layers.append({
            "w_qkv": w((d_model, 3 * d_model)), "b_qkv": b(3 * d_model),
            "w_o1": w((d_model, d_model)), "b_o1": b(d_model),
            "ln1_g": ones(d_model), "ln1_b": b(d_model),
            "w_q2": w((d_model, d_model)), "b_q2": b(d_model),
            "w_kv2": w((d_model, 2 * d_model)), "b_kv2": b(2 * d_model),
            "w_o2": w((d_model, d_model)), "b_o2": b(d_model),
            "ln2_g": ones(d_model), "ln2_b": b(d_model),
            "ffn_w1": w((d_model, ffn_hidden)), "ffn_b1": b(ffn_hidden),
            "ffn_w2": w((ffn_hidden, d_model)), "ffn_b2": b(d_model),
            "ln3_g": ones(d_model), "ln3_b": b(d_model),
        })

    # final vocab projection, padded to a lane-dense multiple of 128
    v_pad = ((dec_voc_size + 127) // 128) * 128
    out_w = jax.random.normal(next(keys), (d_model, dec_voc_size),
                              jnp.float32) * 0.02
    out_w = jnp.pad(out_w, ((0, 0), (0, v_pad - dec_voc_size))
                    ).astype(jnp.bfloat16)

    return {
        "tok_emb": tok_emb,
        "pos_emb": sinusoidal_pe(max_len, d_model),
        "layers": layers,
        "out_w": out_w,
        "out_b": b(v_pad),
    }


# ----------------------------- main -----------------------------

if __name__ == "__main__":
    B, S_TRG, S_SRC = 2, 8, 8
    D_MODEL, N_HEAD, FFN_HIDDEN, N_LAYERS = 32, 4, 64, 2
    DEC_VOC, MAX_LEN = 50, 16

    key = jax.random.PRNGKey(0)
    k_tok, k_enc, k_par = jax.random.split(key, 3)

    trg = jax.random.randint(k_tok, (B, S_TRG), 0, DEC_VOC, dtype=jnp.int32)
    enc_src = jax.random.normal(k_enc, (B, S_SRC, D_MODEL), jnp.float32)

    # causal target mask (B,1,S_trg,S_trg), all-ones source mask (B,1,1,S_src)
    trg_mask = jnp.tril(jnp.ones((S_TRG, S_TRG), jnp.float32))[None, None]
    trg_mask = jnp.broadcast_to(trg_mask, (B, 1, S_TRG, S_TRG))
    src_mask = jnp.ones((B, 1, 1, S_SRC), jnp.float32)

    params = init_params(k_par, DEC_VOC, MAX_LEN, D_MODEL, FFN_HIDDEN,
                         N_LAYERS)

    fwd = jax.jit(functools.partial(decoder_forward, n_head=N_HEAD,
                                    vocab_size=DEC_VOC))
    out = fwd(trg, enc_src, trg_mask, src_mask, params)
    out = jax.block_until_ready(out)
    assert out.shape == (B, S_TRG, DEC_VOC) and out.dtype == jnp.float32
    assert bool(jnp.all(jnp.isfinite(out)))
    print("KERNEL_OK")
</pallas_src>

<mosaic_0001>
module attributes {stable_mosaic.version = 11 : i64} {
  func.func @_matmul_kernel(%arg0: i32, %arg1: i32, %arg2: i32, %arg3: memref<16x32xbf16, #tpu.memory_space<vmem>>, %arg4: memref<32x96xbf16, #tpu.memory_space<vmem>>, %arg5: memref<1x96xf32, #tpu.memory_space<vmem>>, %arg6: memref<16x96xbf16, #tpu.memory_space<vmem>>, %arg7: memref<16x96xf32, #tpu.memory_space<vmem>>) attributes {dimension_semantics = [#tpu.dimension_semantics<parallel>, #tpu.dimension_semantics<parallel>, #tpu.dimension_semantics<arbitrary>], iteration_bounds = array<i64: 1, 1, 1>, scalar_prefetch = 0 : i64, scratch_operands = 1 : i64, tpu.core_type = #tpu.core_type<tc>, window_params = [{transform_indices = @transform_0, window_bounds = array<i64: 16, 32>}, {transform_indices = @transform_1, window_bounds = array<i64: 32, 96>}, {transform_indices = @transform_2, window_bounds = array<i64: 1, 96>}, {transform_indices = @transform_3, window_bounds = array<i64: 16, 96>}]} {
    %c0_i32 = arith.constant 0 : i32
    %0 = arith.cmpi eq, %arg2, %c0_i32 : i32
    %1 = arith.extui %0 : i1 to i32
    %c0_i32_0 = arith.constant 0 : i32
    %2 = arith.cmpi ne, %1, %c0_i32_0 : i32
    scf.if %2 {
      %cst_10 = arith.constant 0.000000e+00 : f32
      %12 = vector.broadcast %cst_10 : f32 to vector<16x96xf32>
      %c0_11 = arith.constant 0 : index
      %c0_12 = arith.constant 0 : index
      %13 = vector.load %arg7[%c0_11, %c0_12] : memref<16x96xf32, #tpu.memory_space<vmem>>, vector<16x96xf32>
      tpu.vector_store %arg7[%c0_11, %c0_12], %12 {strides = array<i32>} : memref<16x96xf32, #tpu.memory_space<vmem>>, vector<16x96xf32>,
    } else {
    }
    %c0 = arith.constant 0 : index
    %c0_1 = arith.constant 0 : index
    %3 = vector.load %arg7[%c0, %c0_1] : memref<16x96xf32, #tpu.memory_space<vmem>>, vector<16x96xf32>
    %c0_2 = arith.constant 0 : index
    %c0_3 = arith.constant 0 : index
    %4 = vector.load %arg3[%c0_2, %c0_3] : memref<16x32xbf16, #tpu.memory_space<vmem>>, vector<16x32xbf16>
    %c0_4 = arith.constant 0 : index
    %c0_5 = arith.constant 0 : index
    %5 = vector.load %arg4[%c0_4, %c0_5] : memref<32x96xbf16, #tpu.memory_space<vmem>>, vector<32x96xbf16>
    %cst = arith.constant dense<0.000000e+00> : vector<16x96xf32>
    %6 = tpu.matmul %4, %5, %cst {dimension_numbers = #tpu.dot_dimension_numbers<[1], [0], [0], [1], [0, 0, 1, 1], [], []>} : vector<16x32xbf16>, vector<32x96xbf16>, vector<16x96xf32> -> vector<16x96xf32>
    %7 = arith.addf %3, %6 : vector<16x96xf32>
    %c0_6 = arith.constant 0 : index
    %c0_7 = arith.constant 0 : index
    %8 = vector.load %arg7[%c0_6, %c0_7] : memref<16x96xf32, #tpu.memory_space<vmem>>, vector<16x96xf32>
    tpu.vector_store %arg7[%c0_6, %c0_7], %7 {strides = array<i32>} : memref<16x96xf32, #tpu.memory_space<vmem>>, vector<16x96xf32>,
    %c0_i32_8 = arith.constant 0 : i32
    %9 = arith.cmpi eq, %arg2, %c0_i32_8 : i32
    %10 = arith.extui %9 : i1 to i32
    %c0_i32_9 = arith.constant 0 : i32
    %11 = arith.cmpi ne, %10, %c0_i32_9 : i32
    scf.if %11 {
      %c0_10 = arith.constant 0 : index
      %c0_11 = arith.constant 0 : index
      %12 = vector.load %arg7[%c0_10, %c0_11] : memref<16x96xf32, #tpu.memory_space<vmem>>, vector<16x96xf32>
      %c0_12 = arith.constant 0 : index
      %c0_13 = arith.constant 0 : index
      %13 = vector.load %arg5[%c0_12, %c0_13] : memref<1x96xf32, #tpu.memory_space<vmem>>, vector<1x96xf32>
      %14 = vector.broadcast %13 : vector<1x96xf32> to vector<16x96xf32>
      %15 = arith.addf %12, %14 : vector<16x96xf32>
      %16 = arith.truncf %15 : vector<16x96xf32> to vector<16x96xbf16>
      %c0_14 = arith.constant 0 : index
      %c0_15 = arith.constant 0 : index
      %17 = vector.load %arg6[%c0_14, %c0_15] : memref<16x96xbf16, #tpu.memory_space<vmem>>, vector<16x96xbf16>
      tpu.vector_store %arg6[%c0_14, %c0_15], %16 {strides = array<i32>} : memref<16x96xbf16, #tpu.memory_space<vmem>>, vector<16x96xbf16>,
    } else {
    }
    return
  }
  func.func @transform_0(%arg0: i32, %arg1: i32, %arg2: i32) -> (i32, i32) {
    %c0_i32 = arith.constant 0 : i32
    return %arg0, %arg2 : i32, i32
  }
  func.func @transform_1(%arg0: i32, %arg1: i32, %arg2: i32) -> (i32, i32) {
    %c0_i32 = arith.constant 0 : i32
    return %arg2, %arg1 : i32, i32
  }
  func.func @transform_2(%arg0: i32, %arg1: i32, %arg2: i32) -> (i32, i32) {
    %c0_i32 = arith.constant 0 : i32
    %c0_i32_0 = arith.constant 0 : i32
    return %c0_i32, %arg1 : i32, i32
  }
  func.func @transform_3(%arg0: i32, %arg1: i32, %arg2: i32) -> (i32, i32) {
    %c0_i32 = arith.constant 0 : i32
    return %arg0, %arg1 : i32, i32
  }
}

module attributes {stable_mosaic.version = 11 : i64} {
  func.func @_self_attn_kernel(%arg0: i32, %arg1: memref<1x8x96xbf16, #tpu.memory_space<vmem>>, %arg2: memref<1x8x8xf32, #tpu.memory_space<vmem>>, %arg3: memref<1x8x32xbf16, #tpu.memory_space<vmem>>) attributes {dimension_semantics = [#tpu.dimension_semantics<parallel>], iteration_bounds = array<i64: 2>, scalar_prefetch = 0 : i64, scratch_operands = 0 : i64, tpu.core_type = #tpu.core_type<tc>, window_params = [{transform_indices = @transform_0, window_bounds = array<i64: 1, 8, 96>}, {transform_indices = @transform_1, window_bounds = array<i64: 1, 8, 8>}, {transform_indices = @transform_2, window_bounds = array<i64: 1, 8, 32>}]} {
    %c0 = arith.constant 0 : index
    %c0_0 = arith.constant 0 : index
    %c0_1 = arith.constant 0 : index
    %0 = vector.load %arg1[%c0, %c0_0, %c0_1] : memref<1x8x96xbf16, #tpu.memory_space<vmem>>, vector<1x8x96xbf16>
    %1 = vector.shape_cast %0 : vector<1x8x96xbf16> to vector<8x96xbf16>
    %2 = vector.extract_strided_slice %1 {offsets = [0, 0], sizes = [8, 32], strides = [1, 1]} : vector<8x96xbf16> to vector<8x32xbf16>
    %3 = vector.extract_strided_slice %1 {offsets = [0, 32], sizes = [8, 32], strides = [1, 1]} : vector<8x96xbf16> to vector<8x32xbf16>
    %4 = vector.extract_strided_slice %1 {offsets = [0, 64], sizes = [8, 32], strides = [1, 1]} : vector<8x96xbf16> to vector<8x32xbf16>
    %c0_2 = arith.constant 0 : index
    %c0_3 = arith.constant 0 : index
    %c0_4 = arith.constant 0 : index
    %5 = vector.load %arg2[%c0_2, %c0_3, %c0_4] : memref<1x8x8xf32, #tpu.memory_space<vmem>>, vector<1x8x8xf32>
    %6 = vector.shape_cast %5 : vector<1x8x8xf32> to vector<8x8xf32>
    %7 = vector.extract_strided_slice %2 {offsets = [0, 0], sizes = [8, 8], strides = [1, 1]} : vector<8x32xbf16> to vector<8x8xbf16>
    %8 = vector.extract_strided_slice %3 {offsets = [0, 0], sizes = [8, 8], strides = [1, 1]} : vector<8x32xbf16> to vector<8x8xbf16>
    %9 = tpu.transpose %8, [1, 0] : vector<8x8xbf16> -> vector<8x8xbf16>
    %cst = arith.constant dense<0.000000e+00> : vector<8x8xf32>
    %10 = tpu.matmul %7, %9, %cst {dimension_numbers = #tpu.dot_dimension_numbers<[1], [0], [0], [1], [0, 0, 1, 1], [], []>} : vector<8x8xbf16>, vector<8x8xbf16>, vector<8x8xf32> -> vector<8x8xf32>
    %cst_5 = arith.constant 0.353553385 : f32
    %11 = vector.broadcast %cst_5 : f32 to vector<8x8xf32>
    %12 = arith.mulf %10, %11 : vector<8x8xf32>
    %cst_6 = arith.constant 0.000000e+00 : f32
    %13 = vector.broadcast %cst_6 : f32 to vector<8x8xf32>
    %14 = arith.cmpf oeq, %6, %13 : vector<8x8xf32>
    %cst_7 = arith.constant -1.000000e+04 : f32
    %15 = vector.broadcast %cst_7 : f32 to vector<8x8xf32>
    %16 = arith.select %14, %15, %12 : vector<8x8xi1>, vector<8x8xf32>
    %cst_8 = arith.constant dense<0xFF800000> : vector<8xf32>
    %17 = vector.multi_reduction <maximumf>, %16, %cst_8 [1] : vector<8x8xf32> to vector<8xf32>
    %18 = vector.shape_cast %17 : vector<8xf32> to vector<8x1xf32>
    %19 = vector.broadcast %18 : vector<8x1xf32> to vector<8x8xf32>
    %20 = arith.subf %16, %19 : vector<8x8xf32>
    %21 = math.exp %20 : vector<8x8xf32>
    %cst_9 = arith.constant dense<0.000000e+00> : vector<8xf32>
    %22 = vector.multi_reduction <add>, %21, %cst_9 [1] : vector<8x8xf32> to vector<8xf32>
    %23 = vector.shape_cast %22 : vector<8xf32> to vector<8x1xf32>
    %24 = tpu.reciprocal %23 {approx = true} : vector<8x1xf32> -> vector<8x1xf32>
    %25 = vector.broadcast %24 : vector<8x1xf32> to vector<8x8xf32>
    %26 = arith.mulf %21, %25 : vector<8x8xf32>
    %27 = arith.truncf %26 : vector<8x8xf32> to vector<8x8xbf16>
    %28 = vector.extract_strided_slice %4 {offsets = [0, 0], sizes = [8, 8], strides = [1, 1]} : vector<8x32xbf16> to vector<8x8xbf16>
    %cst_10 = arith.constant dense<0.000000e+00> : vector<8x8xf32>
    %29 = tpu.matmul %27, %28, %cst_10 {dimension_numbers = #tpu.dot_dimension_numbers<[1], [0], [0], [1], [0, 0, 1, 1], [], []>} : vector<8x8xbf16>, vector<8x8xbf16>, vector<8x8xf32> -> vector<8x8xf32>
    %30 = vector.extract_strided_slice %2 {offsets = [0, 8], sizes = [8, 8], strides = [1, 1]} : vector<8x32xbf16> to vector<8x8xbf16>
    %31 = vector.extract_strided_slice %3 {offsets = [0, 8], sizes = [8, 8], strides = [1, 1]} : vector<8x32xbf16> to vector<8x8xbf16>
    %32 = tpu.transpose %31, [1, 0] : vector<8x8xbf16> -> vector<8x8xbf16>
    %cst_11 = arith.constant dense<0.000000e+00> : vector<8x8xf32>
    %33 = tpu.matmul %30, %32, %cst_11 {dimension_numbers = #tpu.dot_dimension_numbers<[1], [0], [0], [1], [0, 0, 1, 1], [], []>} : vector<8x8xbf16>, vector<8x8xbf16>, vector<8x8xf32> -> vector<8x8xf32>
    %cst_12 = arith.constant 0.353553385 : f32
    %34 = vector.broadcast %cst_12 : f32 to vector<8x8xf32>
    %35 = arith.mulf %33, %34 : vector<8x8xf32>
    %cst_13 = arith.constant 0.000000e+00 : f32
    %36 = vector.broadcast %cst_13 : f32 to vector<8x8xf32>
    %37 = arith.cmpf oeq, %6, %36 : vector<8x8xf32>
    %cst_14 = arith.constant -1.000000e+04 : f32
    %38 = vector.broadcast %cst_14 : f32 to vector<8x8xf32>
    %39 = arith.select %37, %38, %35 : vector<8x8xi1>, vector<8x8xf32>
    %cst_15 = arith.constant dense<0xFF800000> : vector<8xf32>
    %40 = vector.multi_reduction <maximumf>, %39, %cst_15 [1] : vector<8x8xf32> to vector<8xf32>
    %41 = vector.shape_cast %40 : vector<8xf32> to vector<8x1xf32>
    %42 = vector.broadcast %41 : vector<8x1xf32> to vector<8x8xf32>
    %43 = arith.subf %39, %42 : vector<8x8xf32>
    %44 = math.exp %43 : vector<8x8xf32>
    %cst_16 = arith.constant dense<0.000000e+00> : vector<8xf32>
    %45 = vector.multi_reduction <add>, %44, %cst_16 [1] : vector<8x8xf32> to vector<8xf32>
    %46 = vector.shape_cast %45 : vector<8xf32> to vector<8x1xf32>
    %47 = tpu.reciprocal %46 {approx = true} : vector<8x1xf32> -> vector<8x1xf32>
    %48 = vector.broadcast %47 : vector<8x1xf32> to vector<8x8xf32>
    %49 = arith.mulf %44, %48 : vector<8x8xf32>
    %50 = arith.truncf %49 : vector<8x8xf32> to vector<8x8xbf16>
    %51 = vector.extract_strided_slice %4 {offsets = [0, 8], sizes = [8, 8], strides = [1, 1]} : vector<8x32xbf16> to vector<8x8xbf16>
    %cst_17 = arith.constant dense<0.000000e+00> : vector<8x8xf32>
    %52 = tpu.matmul %50, %51, %cst_17 {dimension_numbers = #tpu.dot_dimension_numbers<[1], [0], [0], [1], [0, 0, 1, 1], [], []>} : vector<8x8xbf16>, vector<8x8xbf16>, vector<8x8xf32> -> vector<8x8xf32>
    %53 = vector.extract_strided_slice %2 {offsets = [0, 16], sizes = [8, 8], strides = [1, 1]} : vector<8x32xbf16> to vector<8x8xbf16>
    %54 = vector.extract_strided_slice %3 {offsets = [0, 16], sizes = [8, 8], strides = [1, 1]} : vector<8x32xbf16> to vector<8x8xbf16>
    %55 = tpu.transpose %54, [1, 0] : vector<8x8xbf16> -> vector<8x8xbf16>
    %cst_18 = arith.constant dense<0.000000e+00> : vector<8x8xf32>
    %56 = tpu.matmul %53, %55, %cst_18 {dimension_numbers = #tpu.dot_dimension_numbers<[1], [0], [0], [1], [0, 0, 1, 1], [], []>} : vector<8x8xbf16>, vector<8x8xbf16>, vector<8x8xf32> -> vector<8x8xf32>
    %cst_19 = arith.constant 0.353553385 : f32
    %57 = vector.broadcast %cst_19 : f32 to vector<8x8xf32>
    %58 = arith.mulf %56, %57 : vector<8x8xf32>
    %cst_20 = arith.constant 0.000000e+00 : f32
    %59 = vector.broadcast %cst_20 : f32 to vector<8x8xf32>
    %60 = arith.cmpf oeq, %6, %59 : vector<8x8xf32>
    %cst_21 = arith.constant -1.000000e+04 : f32
    %61 = vector.broadcast %cst_21 : f32 to vector<8x8xf32>
    %62 = arith.select %60, %61, %58 : vector<8x8xi1>, vector<8x8xf32>
    %cst_22 = arith.constant dense<0xFF800000> : vector<8xf32>
    %63 = vector.multi_reduction <maximumf>, %62, %cst_22 [1] : vector<8x8xf32> to vector<8xf32>
    %64 = vector.shape_cast %63 : vector<8xf32> to vector<8x1xf32>
    %65 = vector.broadcast %64 : vector<8x1xf32> to vector<8x8xf32>
    %66 = arith.subf %62, %65 : vector<8x8xf32>
    %67 = math.exp %66 : vector<8x8xf32>
    %cst_23 = arith.constant dense<0.000000e+00> : vector<8xf32>
    %68 = vector.multi_reduction <add>, %67, %cst_23 [1] : vector<8x8xf32> to vector<8xf32>
    %69 = vector.shape_cast %68 : vector<8xf32> to vector<8x1xf32>
    %70 = tpu.reciprocal %69 {approx = true} : vector<8x1xf32> -> vector<8x1xf32>
    %71 = vector.broadcast %70 : vector<8x1xf32> to vector<8x8xf32>
    %72 = arith.mulf %67, %71 : vector<8x8xf32>
    %73 = arith.truncf %72 : vector<8x8xf32> to vector<8x8xbf16>
    %74 = vector.extract_strided_slice %4 {offsets = [0, 16], sizes = [8, 8], strides = [1, 1]} : vector<8x32xbf16> to vector<8x8xbf16>
    %cst_24 = arith.constant dense<0.000000e+00> : vector<8x8xf32>
    %75 = tpu.matmul %73, %74, %cst_24 {dimension_numbers = #tpu.dot_dimension_numbers<[1], [0], [0], [1], [0, 0, 1, 1], [], []>} : vector<8x8xbf16>, vector<8x8xbf16>, vector<8x8xf32> -> vector<8x8xf32>
    %76 = vector.extract_strided_slice %2 {offsets = [0, 24], sizes = [8, 8], strides = [1, 1]} : vector<8x32xbf16> to vector<8x8xbf16>
    %77 = vector.extract_strided_slice %3 {offsets = [0, 24], sizes = [8, 8], strides = [1, 1]} : vector<8x32xbf16> to vector<8x8xbf16>
    %78 = tpu.transpose %77, [1, 0] : vector<8x8xbf16> -> vector<8x8xbf16>
    %cst_25 = arith.constant dense<0.000000e+00> : vector<8x8xf32>
    %79 = tpu.matmul %76, %78, %cst_25 {dimension_numbers = #tpu.dot_dimension_numbers<[1], [0], [0], [1], [0, 0, 1, 1], [], []>} : vector<8x8xbf16>, vector<8x8xbf16>, vector<8x8xf32> -> vector<8x8xf32>
    %cst_26 = arith.constant 0.353553385 : f32
    %80 = vector.broadcast %cst_26 : f32 to vector<8x8xf32>
    %81 = arith.mulf %79, %80 : vector<8x8xf32>
    %cst_27 = arith.constant 0.000000e+00 : f32
    %82 = vector.broadcast %cst_27 : f32 to vector<8x8xf32>
    %83 = arith.cmpf oeq, %6, %82 : vector<8x8xf32>
    %cst_28 = arith.constant -1.000000e+04 : f32
    %84 = vector.broadcast %cst_28 : f32 to vector<8x8xf32>
    %85 = arith.select %83, %84, %81 : vector<8x8xi1>, vector<8x8xf32>
    %cst_29 = arith.constant dense<0xFF800000> : vector<8xf32>
    %86 = vector.multi_reduction <maximumf>, %85, %cst_29 [1] : vector<8x8xf32> to vector<8xf32>
    %87 = vector.shape_cast %86 : vector<8xf32> to vector<8x1xf32>
    %88 = vector.broadcast %87 : vector<8x1xf32> to vector<8x8xf32>
    %89 = arith.subf %85, %88 : vector<8x8xf32>
    %90 = math.exp %89 : vector<8x8xf32>
    %cst_30 = arith.constant dense<0.000000e+00> : vector<8xf32>
    %91 = vector.multi_reduction <add>, %90, %cst_30 [1] : vector<8x8xf32> to vector<8xf32>
    %92 = vector.shape_cast %91 : vector<8xf32> to vector<8x1xf32>
    %93 = tpu.reciprocal %92 {approx = true} : vector<8x1xf32> -> vector<8x1xf32>
    %94 = vector.broadcast %93 : vector<8x1xf32> to vector<8x8xf32>
    %95 = arith.mulf %90, %94 : vector<8x8xf32>
    %96 = arith.truncf %95 : vector<8x8xf32> to vector<8x8xbf16>
    %97 = vector.extract_strided_slice %4 {offsets = [0, 24], sizes = [8, 8], strides = [1, 1]} : vector<8x32xbf16> to vector<8x8xbf16>
    %cst_31 = arith.constant dense<0.000000e+00> : vector<8x8xf32>
    %98 = tpu.matmul %96, %97, %cst_31 {dimension_numbers = #tpu.dot_dimension_numbers<[1], [0], [0], [1], [0, 0, 1, 1], [], []>} : vector<8x8xbf16>, vector<8x8xbf16>, vector<8x8xf32> -> vector<8x8xf32>
    %99 = tpu.concatenate %29, %52, %75, %98 in 1 : vector<8x8xf32>, vector<8x8xf32>, vector<8x8xf32>, vector<8x8xf32> -> vector<8x32xf32>
    %100 = arith.truncf %99 : vector<8x32xf32> to vector<8x32xbf16>
    %c0_32 = arith.constant 0 : index
    %c0_33 = arith.constant 0 : index
    %c0_34 = arith.constant 0 : index
    %101 = vector.load %arg3[%c0_32, %c0_33, %c0_34] : memref<1x8x32xbf16, #tpu.memory_space<vmem>>, vector<1x8x32xbf16>
    %102 = vector.shape_cast %101 : vector<1x8x32xbf16> to vector<8x32xbf16>
    %103 = vector.shape_cast %100 : vector<8x32xbf16> to vector<1x8x32xbf16>
    tpu.vector_store %arg3[%c0_32, %c0_33, %c0_34], %103 {strides = array<i32>} : memref<1x8x32xbf16, #tpu.memory_space<vmem>>, vector<1x8x32xbf16>,
    return
  }
  func.func @transform_0(%arg0: i32) -> (i32, i32, i32) {
    %c0_i32 = arith.constant 0 : i32
    %c0_i32_0 = arith.constant 0 : i32
    %c0_i32_1 = arith.constant 0 : i32
    return %arg0, %c0_i32, %c0_i32_0 : i32, i32, i32
  }
  func.func @transform_1(%arg0: i32) -> (i32, i32, i32) {
    %c0_i32 = arith.constant 0 : i32
    %c0_i32_0 = arith.constant 0 : i32
    %c0_i32_1 = arith.constant 0 : i32
    return %arg0, %c0_i32, %c0_i32_0 : i32, i32, i32
  }
  func.func @transform_2(%arg0: i32) -> (i32, i32, i32) {
    %c0_i32 = arith.constant 0 : i32
    %c0_i32_0 = arith.constant 0 : i32
    %c0_i32_1 = arith.constant 0 : i32
    return %arg0, %c0_i32, %c0_i32_0 : i32, i32, i32
  }
}

module attributes {stable_mosaic.version = 11 : i64} {
  func.func @_matmul_add_ln_kernel(%arg0: i32, %arg1: i32, %arg2: memref<16x32xbf16, #tpu.memory_space<vmem>>, %arg3: memref<32x32xbf16, #tpu.memory_space<vmem>>, %arg4: memref<1x32xf32, #tpu.memory_space<vmem>>, %arg5: memref<16x32xbf16, #tpu.memory_space<vmem>>, %arg6: memref<1x32xf32, #tpu.memory_space<vmem>>, %arg7: memref<1x32xf32, #tpu.memory_space<vmem>>, %arg8: memref<16x32xbf16, #tpu.memory_space<vmem>>, %arg9: memref<16x32xf32, #tpu.memory_space<vmem>>) attributes {dimension_semantics = [#tpu.dimension_semantics<parallel>, #tpu.dimension_semantics<arbitrary>], iteration_bounds = array<i64: 1, 1>, scalar_prefetch = 0 : i64, scratch_operands = 1 : i64, tpu.core_type = #tpu.core_type<tc>, window_params = [{transform_indices = @transform_0, window_bounds = array<i64: 16, 32>}, {transform_indices = @transform_1, window_bounds = array<i64: 32, 32>}, {pipeline_mode = #tpu.pipeline_mode<synchronous>, transform_indices = @transform_2, window_bounds = array<i64: 1, 32>}, {transform_indices = @transform_3, window_bounds = array<i64: 16, 32>}, {pipeline_mode = #tpu.pipeline_mode<synchronous>, transform_indices = @transform_4, window_bounds = array<i64: 1, 32>}, {pipeline_mode = #tpu.pipeline_mode<synchronous>, transform_indices = @transform_5, window_bounds = array<i64: 1, 32>}, {transform_indices = @transform_6, window_bounds = array<i64: 16, 32>}]} {
    %c0_i32 = arith.constant 0 : i32
    %0 = arith.cmpi eq, %arg1, %c0_i32 : i32
    %1 = arith.extui %0 : i1 to i32
    %c0_i32_0 = arith.constant 0 : i32
    %2 = arith.cmpi ne, %1, %c0_i32_0 : i32
    scf.if %2 {
      %cst_10 = arith.constant 0.000000e+00 : f32
      %12 = vector.broadcast %cst_10 : f32 to vector<16x32xf32>
      %c0_11 = arith.constant 0 : index
      %c0_12 = arith.constant 0 : index
      %13 = vector.load %arg9[%c0_11, %c0_12] : memref<16x32xf32, #tpu.memory_space<vmem>>, vector<16x32xf32>
      tpu.vector_store %arg9[%c0_11, %c0_12], %12 {strides = array<i32>} : memref<16x32xf32, #tpu.memory_space<vmem>>, vector<16x32xf32>,
    } else {
    }
    %c0 = arith.constant 0 : index
    %c0_1 = arith.constant 0 : index
    %3 = vector.load %arg9[%c0, %c0_1] : memref<16x32xf32, #tpu.memory_space<vmem>>, vector<16x32xf32>
    %c0_2 = arith.constant 0 : index
    %c0_3 = arith.constant 0 : index
    %4 = vector.load %arg2[%c0_2, %c0_3] : memref<16x32xbf16, #tpu.memory_space<vmem>>, vector<16x32xbf16>
    %c0_4 = arith.constant 0 : index
    %c0_5 = arith.constant 0 : index
    %5 = vector.load %arg3[%c0_4, %c0_5] : memref<32x32xbf16, #tpu.memory_space<vmem>>, vector<32x32xbf16>
    %cst = arith.constant dense<0.000000e+00> : vector<16x32xf32>
    %6 = tpu.matmul %4, %5, %cst {dimension_numbers = #tpu.dot_dimension_numbers<[1], [0], [0], [1], [0, 0, 1, 1], [], []>} : vector<16x32xbf16>, vector<32x32xbf16>, vector<16x32xf32> -> vector<16x32xf32>
    %7 = arith.addf %3, %6 : vector<16x32xf32>
    %c0_6 = arith.constant 0 : index
    %c0_7 = arith.constant 0 : index
    %8 = vector.load %arg9[%c0_6, %c0_7] : memref<16x32xf32, #tpu.memory_space<vmem>>, vector<16x32xf32>
    tpu.vector_store %arg9[%c0_6, %c0_7], %7 {strides = array<i32>} : memref<16x32xf32, #tpu.memory_space<vmem>>, vector<16x32xf32>,
    %c0_i32_8 = arith.constant 0 : i32
    %9 = arith.cmpi eq, %arg1, %c0_i32_8 : i32
    %10 = arith.extui %9 : i1 to i32
    %c0_i32_9 = arith.constant 0 : i32
    %11 = arith.cmpi ne, %10, %c0_i32_9 : i32
    scf.if %11 {
      %c0_10 = arith.constant 0 : index
      %c0_11 = arith.constant 0 : index
      %12 = vector.load %arg9[%c0_10, %c0_11] : memref<16x32xf32, #tpu.memory_space<vmem>>, vector<16x32xf32>
      %c0_12 = arith.constant 0 : index
      %c0_13 = arith.constant 0 : index
      %13 = vector.load %arg4[%c0_12, %c0_13] : memref<1x32xf32, #tpu.memory_space<vmem>>, vector<1x32xf32>
      %14 = vector.broadcast %13 : vector<1x32xf32> to vector<16x32xf32>
      %15 = arith.addf %12, %14 : vector<16x32xf32>
      %c0_14 = arith.constant 0 : index
      %c0_15 = arith.constant 0 : index
      %16 = vector.load %arg5[%c0_14, %c0_15] : memref<16x32xbf16, #tpu.memory_space<vmem>>, vector<16x32xbf16>
      %17 = arith.extf %16 : vector<16x32xbf16> to vector<16x32xf32>
      %18 = arith.addf %15, %17 : vector<16x32xf32>
      %cst_16 = arith.constant dense<0.000000e+00> : vector<16xf32>
      %19 = vector.multi_reduction <add>, %18, %cst_16 [1] : vector<16x32xf32> to vector<16xf32>
      %20 = vector.shape_cast %19 : vector<16xf32> to vector<16x1xf32>
      %cst_17 = arith.constant 3.200000e+01 : f32
      %21 = vector.broadcast %cst_17 : f32 to vector<16x1xf32>
      %22 = arith.divf %20, %21 : vector<16x1xf32>
      %23 = vector.broadcast %22 : vector<16x1xf32> to vector<16x32xf32>
      %24 = arith.subf %18, %23 : vector<16x32xf32>
      %25 = arith.mulf %24, %24 : vector<16x32xf32>
      %cst_18 = arith.constant dense<0.000000e+00> : vector<16xf32>
      %26 = vector.multi_reduction <add>, %25, %cst_18 [1] : vector<16x32xf32> to vector<16xf32>
      %27 = vector.shape_cast %26 : vector<16xf32> to vector<16x1xf32>
      %cst_19 = arith.constant 3.200000e+01 : f32
      %28 = vector.broadcast %cst_19 : f32 to vector<16x1xf32>
      %29 = arith.divf %27, %28 : vector<16x1xf32>
      %cst_20 = arith.constant 9.99999996E-13 : f32
      %30 = vector.broadcast %cst_20 : f32 to vector<16x1xf32>
      %31 = arith.addf %29, %30 : vector<16x1xf32>
      %32 = math.rsqrt %31 : vector<16x1xf32>
      %33 = vector.broadcast %22 : vector<16x1xf32> to vector<16x32xf32>
      %34 = arith.subf %18, %33 : vector<16x32xf32>
      %35 = vector.broadcast %32 : vector<16x1xf32> to vector<16x32xf32>
      %36 = arith.mulf %34, %35 : vector<16x32xf32>
      %c0_21 = arith.constant 0 : index
      %c0_22 = arith.constant 0 : index
      %37 = vector.load %arg6[%c0_21, %c0_22] : memref<1x32xf32, #tpu.memory_space<vmem>>, vector<1x32xf32>
      %38 = vector.broadcast %37 : vector<1x32xf32> to vector<16x32xf32>
      %39 = arith.mulf %36, %38 : vector<16x32xf32>
      %c0_23 = arith.constant 0 : index
      %c0_24 = arith.constant 0 : index
      %40 = vector.load %arg7[%c0_23, %c0_24] : memref<1x32xf32, #tpu.memory_space<vmem>>, vector<1x32xf32>
      %41 = vector.broadcast %40 : vector<1x32xf32> to vector<16x32xf32>
      %42 = arith.addf %39, %41 : vector<16x32xf32>
      %43 = arith.truncf %42 : vector<16x32xf32> to vector<16x32xbf16>
      %c0_25 = arith.constant 0 : index
      %c0_26 = arith.constant 0 : index
      %44 = vector.load %arg8[%c0_25, %c0_26] : memref<16x32xbf16, #tpu.memory_space<vmem>>, vector<16x32xbf16>
      tpu.vector_store %arg8[%c0_25, %c0_26], %43 {strides = array<i32>} : memref<16x32xbf16, #tpu.memory_space<vmem>>, vector<16x32xbf16>,
    } else {
    }
    return
  }
  func.func @transform_0(%arg0: i32, %arg1: i32) -> (i32, i32) {
    %c0_i32 = arith.constant 0 : i32
    return %arg0, %arg1 : i32, i32
  }
  func.func @transform_1(%arg0: i32, %arg1: i32) -> (i32, i32) {
    %c0_i32 = arith.constant 0 : i32
    %c0_i32_0 = arith.constant 0 : i32
    return %arg1, %c0_i32 : i32, i32
  }
  func.func @transform_2(%arg0: i32, %arg1: i32) -> (i32, i32) {
    %c0_i32 = arith.constant 0 : i32
    %c0_i32_0 = arith.constant 0 : i32
    %c0_i32_1 = arith.constant 0 : i32
    return %c0_i32, %c0_i32_0 : i32, i32
  }
  func.func @transform_3(%arg0: i32, %arg1: i32) -> (i32, i32) {
    %c0_i32 = arith.constant 0 : i32
    %c0_i32_0 = arith.constant 0 : i32
    return %arg0, %c0_i32 : i32, i32
  }
  func.func @transform_4(%arg0: i32, %arg1: i32) -> (i32, i32) {
    %c0_i32 = arith.constant 0 : i32
    %c0_i32_0 = arith.constant 0 : i32
    %c0_i32_1 = arith.constant 0 : i32
    return %c0_i32, %c0_i32_0 : i32, i32
  }
  func.func @transform_5(%arg0: i32, %arg1: i32) -> (i32, i32) {
    %c0_i32 = arith.constant 0 : i32
    %c0_i32_0 = arith.constant 0 : i32
    %c0_i32_1 = arith.constant 0 : i32
    return %c0_i32, %c0_i32_0 : i32, i32
  }
  func.func @transform_6(%arg0: i32, %arg1: i32) -> (i32, i32) {
    %c0_i32 = arith.constant 0 : i32
    %c0_i32_0 = arith.constant 0 : i32
    return %arg0, %c0_i32 : i32, i32
  }
}

module attributes {stable_mosaic.version = 11 : i64} {
  func.func @_matmul_kernel(%arg0: i32, %arg1: i32, %arg2: i32, %arg3: memref<16x32xbf16, #tpu.memory_space<vmem>>, %arg4: memref<32x32xbf16, #tpu.memory_space<vmem>>, %arg5: memref<1x32xf32, #tpu.memory_space<vmem>>, %arg6: memref<16x32xbf16, #tpu.memory_space<vmem>>, %arg7: memref<16x32xf32, #tpu.memory_space<vmem>>) attributes {dimension_semantics = [#tpu.dimension_semantics<parallel>, #tpu.dimension_semantics<parallel>, #tpu.dimension_semantics<arbitrary>], iteration_bounds = array<i64: 1, 1, 1>, scalar_prefetch = 0 : i64, scratch_operands = 1 : i64, tpu.core_type = #tpu.core_type<tc>, window_params = [{transform_indices = @transform_0, window_bounds = array<i64: 16, 32>}, {transform_indices = @transform_1, window_bounds = array<i64: 32, 32>}, {transform_indices = @transform_2, window_bounds = array<i64: 1, 32>}, {transform_indices = @transform_3, window_bounds = array<i64: 16, 32>}]} {
    %c0_i32 = arith.constant 0 : i32
    %0 = arith.cmpi eq, %arg2, %c0_i32 : i32
    %1 = arith.extui %0 : i1 to i32
    %c0_i32_0 = arith.constant 0 : i32
    %2 = arith.cmpi ne, %1, %c0_i32_0 : i32
    scf.if %2 {
      %cst_10 = arith.constant 0.000000e+00 : f32
      %12 = vector.broadcast %cst_10 : f32 to vector<16x32xf32>
      %c0_11 = arith.constant 0 : index
      %c0_12 = arith.constant 0 : index
      %13 = vector.load %arg7[%c0_11, %c0_12] : memref<16x32xf32, #tpu.memory_space<vmem>>, vector<16x32xf32>
      tpu.vector_store %arg7[%c0_11, %c0_12], %12 {strides = array<i32>} : memref<16x32xf32, #tpu.memory_space<vmem>>, vector<16x32xf32>,
    } else {
    }
    %c0 = arith.constant 0 : index
    %c0_1 = arith.constant 0 : index
    %3 = vector.load %arg7[%c0, %c0_1] : memref<16x32xf32, #tpu.memory_space<vmem>>, vector<16x32xf32>
    %c0_2 = arith.constant 0 : index
    %c0_3 = arith.constant 0 : index
    %4 = vector.load %arg3[%c0_2, %c0_3] : memref<16x32xbf16, #tpu.memory_space<vmem>>, vector<16x32xbf16>
    %c0_4 = arith.constant 0 : index
    %c0_5 = arith.constant 0 : index
    %5 = vector.load %arg4[%c0_4, %c0_5] : memref<32x32xbf16, #tpu.memory_space<vmem>>, vector<32x32xbf16>
    %cst = arith.constant dense<0.000000e+00> : vector<16x32xf32>
    %6 = tpu.matmul %4, %5, %cst {dimension_numbers = #tpu.dot_dimension_numbers<[1], [0], [0], [1], [0, 0, 1, 1], [], []>} : vector<16x32xbf16>, vector<32x32xbf16>, vector<16x32xf32> -> vector<16x32xf32>
    %7 = arith.addf %3, %6 : vector<16x32xf32>
    %c0_6 = arith.constant 0 : index
    %c0_7 = arith.constant 0 : index
    %8 = vector.load %arg7[%c0_6, %c0_7] : memref<16x32xf32, #tpu.memory_space<vmem>>, vector<16x32xf32>
    tpu.vector_store %arg7[%c0_6, %c0_7], %7 {strides = array<i32>} : memref<16x32xf32, #tpu.memory_space<vmem>>, vector<16x32xf32>,
    %c0_i32_8 = arith.constant 0 : i32
    %9 = arith.cmpi eq, %arg2, %c0_i32_8 : i32
    %10 = arith.extui %9 : i1 to i32
    %c0_i32_9 = arith.constant 0 : i32
    %11 = arith.cmpi ne, %10, %c0_i32_9 : i32
    scf.if %11 {
      %c0_10 = arith.constant 0 : index
      %c0_11 = arith.constant 0 : index
      %12 = vector.load %arg7[%c0_10, %c0_11] : memref<16x32xf32, #tpu.memory_space<vmem>>, vector<16x32xf32>
      %c0_12 = arith.constant 0 : index
      %c0_13 = arith.constant 0 : index
      %13 = vector.load %arg5[%c0_12, %c0_13] : memref<1x32xf32, #tpu.memory_space<vmem>>, vector<1x32xf32>
      %14 = vector.broadcast %13 : vector<1x32xf32> to vector<16x32xf32>
      %15 = arith.addf %12, %14 : vector<16x32xf32>
      %16 = arith.truncf %15 : vector<16x32xf32> to vector<16x32xbf16>
      %c0_14 = arith.constant 0 : index
      %c0_15 = arith.constant 0 : index
      %17 = vector.load %arg6[%c0_14, %c0_15] : memref<16x32xbf16, #tpu.memory_space<vmem>>, vector<16x32xbf16>
      tpu.vector_store %arg6[%c0_14, %c0_15], %16 {strides = array<i32>} : memref<16x32xbf16, #tpu.memory_space<vmem>>, vector<16x32xbf16>,
    } else {
    }
    return
  }
  func.func @transform_0(%arg0: i32, %arg1: i32, %arg2: i32) -> (i32, i32) {
    %c0_i32 = arith.constant 0 : i32
    return %arg0, %arg2 : i32, i32
  }
  func.func @transform_1(%arg0: i32, %arg1: i32, %arg2: i32) -> (i32, i32) {
    %c0_i32 = arith.constant 0 : i32
    return %arg2, %arg1 : i32, i32
  }
  func.func @transform_2(%arg0: i32, %arg1: i32, %arg2: i32) -> (i32, i32) {
    %c0_i32 = arith.constant 0 : i32
    %c0_i32_0 = arith.constant 0 : i32
    return %c0_i32, %arg1 : i32, i32
  }
  func.func @transform_3(%arg0: i32, %arg1: i32, %arg2: i32) -> (i32, i32) {
    %c0_i32 = arith.constant 0 : i32
    return %arg0, %arg1 : i32, i32
  }
}

module attributes {stable_mosaic.version = 11 : i64} {
  func.func @_matmul_kernel(%arg0: i32, %arg1: i32, %arg2: i32, %arg3: memref<16x32xbf16, #tpu.memory_space<vmem>>, %arg4: memref<32x64xbf16, #tpu.memory_space<vmem>>, %arg5: memref<1x64xf32, #tpu.memory_space<vmem>>, %arg6: memref<16x64xbf16, #tpu.memory_space<vmem>>, %arg7: memref<16x64xf32, #tpu.memory_space<vmem>>) attributes {dimension_semantics = [#tpu.dimension_semantics<parallel>, #tpu.dimension_semantics<parallel>, #tpu.dimension_semantics<arbitrary>], iteration_bounds = array<i64: 1, 1, 1>, scalar_prefetch = 0 : i64, scratch_operands = 1 : i64, tpu.core_type = #tpu.core_type<tc>, window_params = [{transform_indices = @transform_0, window_bounds = array<i64: 16, 32>}, {transform_indices = @transform_1, window_bounds = array<i64: 32, 64>}, {transform_indices = @transform_2, window_bounds = array<i64: 1, 64>}, {transform_indices = @transform_3, window_bounds = array<i64: 16, 64>}]} {
    %c0_i32 = arith.constant 0 : i32
    %0 = arith.cmpi eq, %arg2, %c0_i32 : i32
    %1 = arith.extui %0 : i1 to i32
    %c0_i32_0 = arith.constant 0 : i32
    %2 = arith.cmpi ne, %1, %c0_i32_0 : i32
    scf.if %2 {
      %cst_10 = arith.constant 0.000000e+00 : f32
      %12 = vector.broadcast %cst_10 : f32 to vector<16x64xf32>
      %c0_11 = arith.constant 0 : index
      %c0_12 = arith.constant 0 : index
      %13 = vector.load %arg7[%c0_11, %c0_12] : memref<16x64xf32, #tpu.memory_space<vmem>>, vector<16x64xf32>
      tpu.vector_store %arg7[%c0_11, %c0_12], %12 {strides = array<i32>} : memref<16x64xf32, #tpu.memory_space<vmem>>, vector<16x64xf32>,
    } else {
    }
    %c0 = arith.constant 0 : index
    %c0_1 = arith.constant 0 : index
    %3 = vector.load %arg7[%c0, %c0_1] : memref<16x64xf32, #tpu.memory_space<vmem>>, vector<16x64xf32>
    %c0_2 = arith.constant 0 : index
    %c0_3 = arith.constant 0 : index
    %4 = vector.load %arg3[%c0_2, %c0_3] : memref<16x32xbf16, #tpu.memory_space<vmem>>, vector<16x32xbf16>
    %c0_4 = arith.constant 0 : index
    %c0_5 = arith.constant 0 : index
    %5 = vector.load %arg4[%c0_4, %c0_5] : memref<32x64xbf16, #tpu.memory_space<vmem>>, vector<32x64xbf16>
    %cst = arith.constant dense<0.000000e+00> : vector<16x64xf32>
    %6 = tpu.matmul %4, %5, %cst {dimension_numbers = #tpu.dot_dimension_numbers<[1], [0], [0], [1], [0, 0, 1, 1], [], []>} : vector<16x32xbf16>, vector<32x64xbf16>, vector<16x64xf32> -> vector<16x64xf32>
    %7 = arith.addf %3, %6 : vector<16x64xf32>
    %c0_6 = arith.constant 0 : index
    %c0_7 = arith.constant 0 : index
    %8 = vector.load %arg7[%c0_6, %c0_7] : memref<16x64xf32, #tpu.memory_space<vmem>>, vector<16x64xf32>
    tpu.vector_store %arg7[%c0_6, %c0_7], %7 {strides = array<i32>} : memref<16x64xf32, #tpu.memory_space<vmem>>, vector<16x64xf32>,
    %c0_i32_8 = arith.constant 0 : i32
    %9 = arith.cmpi eq, %arg2, %c0_i32_8 : i32
    %10 = arith.extui %9 : i1 to i32
    %c0_i32_9 = arith.constant 0 : i32
    %11 = arith.cmpi ne, %10, %c0_i32_9 : i32
    scf.if %11 {
      %c0_10 = arith.constant 0 : index
      %c0_11 = arith.constant 0 : index
      %12 = vector.load %arg7[%c0_10, %c0_11] : memref<16x64xf32, #tpu.memory_space<vmem>>, vector<16x64xf32>
      %c0_12 = arith.constant 0 : index
      %c0_13 = arith.constant 0 : index
      %13 = vector.load %arg5[%c0_12, %c0_13] : memref<1x64xf32, #tpu.memory_space<vmem>>, vector<1x64xf32>
      %14 = vector.broadcast %13 : vector<1x64xf32> to vector<16x64xf32>
      %15 = arith.addf %12, %14 : vector<16x64xf32>
      %16 = arith.truncf %15 : vector<16x64xf32> to vector<16x64xbf16>
      %c0_14 = arith.constant 0 : index
      %c0_15 = arith.constant 0 : index
      %17 = vector.load %arg6[%c0_14, %c0_15] : memref<16x64xbf16, #tpu.memory_space<vmem>>, vector<16x64xbf16>
      tpu.vector_store %arg6[%c0_14, %c0_15], %16 {strides = array<i32>} : memref<16x64xbf16, #tpu.memory_space<vmem>>, vector<16x64xbf16>,
    } else {
    }
    return
  }
  func.func @transform_0(%arg0: i32, %arg1: i32, %arg2: i32) -> (i32, i32) {
    %c0_i32 = arith.constant 0 : i32
    return %arg0, %arg2 : i32, i32
  }
  func.func @transform_1(%arg0: i32, %arg1: i32, %arg2: i32) -> (i32, i32) {
    %c0_i32 = arith.constant 0 : i32
    return %arg2, %arg1 : i32, i32
  }
  func.func @transform_2(%arg0: i32, %arg1: i32, %arg2: i32) -> (i32, i32) {
    %c0_i32 = arith.constant 0 : i32
    %c0_i32_0 = arith.constant 0 : i32
    return %c0_i32, %arg1 : i32, i32
  }
  func.func @transform_3(%arg0: i32, %arg1: i32, %arg2: i32) -> (i32, i32) {
    %c0_i32 = arith.constant 0 : i32
    return %arg0, %arg1 : i32, i32
  }
}

module attributes {stable_mosaic.version = 11 : i64} {
  func.func @_matmul_kernel(%arg0: i32, %arg1: i32, %arg2: i32, %arg3: memref<16x32xbf16, #tpu.memory_space<vmem>>, %arg4: memref<32x64xbf16, #tpu.memory_space<vmem>>, %arg5: memref<1x64xf32, #tpu.memory_space<vmem>>, %arg6: memref<16x64xbf16, #tpu.memory_space<vmem>>, %arg7: memref<16x64xf32, #tpu.memory_space<vmem>>) attributes {dimension_semantics = [#tpu.dimension_semantics<parallel>, #tpu.dimension_semantics<parallel>, #tpu.dimension_semantics<arbitrary>], iteration_bounds = array<i64: 1, 1, 1>, scalar_prefetch = 0 : i64, scratch_operands = 1 : i64, tpu.core_type = #tpu.core_type<tc>, window_params = [{transform_indices = @transform_0, window_bounds = array<i64: 16, 32>}, {transform_indices = @transform_1, window_bounds = array<i64: 32, 64>}, {transform_indices = @transform_2, window_bounds = array<i64: 1, 64>}, {transform_indices = @transform_3, window_bounds = array<i64: 16, 64>}]} {
    %c0_i32 = arith.constant 0 : i32
    %0 = arith.cmpi eq, %arg2, %c0_i32 : i32
    %1 = arith.extui %0 : i1 to i32
    %c0_i32_0 = arith.constant 0 : i32
    %2 = arith.cmpi ne, %1, %c0_i32_0 : i32
    scf.if %2 {
      %cst_10 = arith.constant 0.000000e+00 : f32
      %12 = vector.broadcast %cst_10 : f32 to vector<16x64xf32>
      %c0_11 = arith.constant 0 : index
      %c0_12 = arith.constant 0 : index
      %13 = vector.load %arg7[%c0_11, %c0_12] : memref<16x64xf32, #tpu.memory_space<vmem>>, vector<16x64xf32>
      tpu.vector_store %arg7[%c0_11, %c0_12], %12 {strides = array<i32>} : memref<16x64xf32, #tpu.memory_space<vmem>>, vector<16x64xf32>,
    } else {
    }
    %c0 = arith.constant 0 : index
    %c0_1 = arith.constant 0 : index
    %3 = vector.load %arg7[%c0, %c0_1] : memref<16x64xf32, #tpu.memory_space<vmem>>, vector<16x64xf32>
    %c0_2 = arith.constant 0 : index
    %c0_3 = arith.constant 0 : index
    %4 = vector.load %arg3[%c0_2, %c0_3] : memref<16x32xbf16, #tpu.memory_space<vmem>>, vector<16x32xbf16>
    %c0_4 = arith.constant 0 : index
    %c0_5 = arith.constant 0 : index
    %5 = vector.load %arg4[%c0_4, %c0_5] : memref<32x64xbf16, #tpu.memory_space<vmem>>, vector<32x64xbf16>
    %cst = arith.constant dense<0.000000e+00> : vector<16x64xf32>
    %6 = tpu.matmul %4, %5, %cst {dimension_numbers = #tpu.dot_dimension_numbers<[1], [0], [0], [1], [0, 0, 1, 1], [], []>} : vector<16x32xbf16>, vector<32x64xbf16>, vector<16x64xf32> -> vector<16x64xf32>
    %7 = arith.addf %3, %6 : vector<16x64xf32>
    %c0_6 = arith.constant 0 : index
    %c0_7 = arith.constant 0 : index
    %8 = vector.load %arg7[%c0_6, %c0_7] : memref<16x64xf32, #tpu.memory_space<vmem>>, vector<16x64xf32>
    tpu.vector_store %arg7[%c0_6, %c0_7], %7 {strides = array<i32>} : memref<16x64xf32, #tpu.memory_space<vmem>>, vector<16x64xf32>,
    %c0_i32_8 = arith.constant 0 : i32
    %9 = arith.cmpi eq, %arg2, %c0_i32_8 : i32
    %10 = arith.extui %9 : i1 to i32
    %c0_i32_9 = arith.constant 0 : i32
    %11 = arith.cmpi ne, %10, %c0_i32_9 : i32
    scf.if %11 {
      %c0_10 = arith.constant 0 : index
      %c0_11 = arith.constant 0 : index
      %12 = vector.load %arg7[%c0_10, %c0_11] : memref<16x64xf32, #tpu.memory_space<vmem>>, vector<16x64xf32>
      %c0_12 = arith.constant 0 : index
      %c0_13 = arith.constant 0 : index
      %13 = vector.load %arg5[%c0_12, %c0_13] : memref<1x64xf32, #tpu.memory_space<vmem>>, vector<1x64xf32>
      %14 = vector.broadcast %13 : vector<1x64xf32> to vector<16x64xf32>
      %15 = arith.addf %12, %14 : vector<16x64xf32>
      %cst_14 = arith.constant 0.000000e+00 : f32
      %16 = vector.broadcast %cst_14 : f32 to vector<16x64xf32>
      %17 = arith.maximumf %15, %16 : vector<16x64xf32>
      %18 = arith.truncf %17 : vector<16x64xf32> to vector<16x64xbf16>
      %c0_15 = arith.constant 0 : index
      %c0_16 = arith.constant 0 : index
      %19 = vector.load %arg6[%c0_15, %c0_16] : memref<16x64xbf16, #tpu.memory_space<vmem>>, vector<16x64xbf16>
      tpu.vector_store %arg6[%c0_15, %c0_16], %18 {strides = array<i32>} : memref<16x64xbf16, #tpu.memory_space<vmem>>, vector<16x64xbf16>,
    } else {
    }
    return
  }
  func.func @transform_0(%arg0: i32, %arg1: i32, %arg2: i32) -> (i32, i32) {
    %c0_i32 = arith.constant 0 : i32
    return %arg0, %arg2 : i32, i32
  }
  func.func @transform_1(%arg0: i32, %arg1: i32, %arg2: i32) -> (i32, i32) {
    %c0_i32 = arith.constant 0 : i32
    return %arg2, %arg1 : i32, i32
  }
  func.func @transform_2(%arg0: i32, %arg1: i32, %arg2: i32) -> (i32, i32) {
    %c0_i32 = arith.constant 0 : i32
    %c0_i32_0 = arith.constant 0 : i32
    return %c0_i32, %arg1 : i32, i32
  }
  func.func @transform_3(%arg0: i32, %arg1: i32, %arg2: i32) -> (i32, i32) {
    %c0_i32 = arith.constant 0 : i32
    return %arg0, %arg1 : i32, i32
  }
}

module attributes {stable_mosaic.version = 11 : i64} {
  func.func @_matmul_add_ln_kernel(%arg0: i32, %arg1: i32, %arg2: memref<16x64xbf16, #tpu.memory_space<vmem>>, %arg3: memref<64x32xbf16, #tpu.memory_space<vmem>>, %arg4: memref<1x32xf32, #tpu.memory_space<vmem>>, %arg5: memref<16x32xbf16, #tpu.memory_space<vmem>>, %arg6: memref<1x32xf32, #tpu.memory_space<vmem>>, %arg7: memref<1x32xf32, #tpu.memory_space<vmem>>, %arg8: memref<16x32xbf16, #tpu.memory_space<vmem>>, %arg9: memref<16x32xf32, #tpu.memory_space<vmem>>) attributes {dimension_semantics = [#tpu.dimension_semantics<parallel>, #tpu.dimension_semantics<arbitrary>], iteration_bounds = array<i64: 1, 1>, scalar_prefetch = 0 : i64, scratch_operands = 1 : i64, tpu.core_type = #tpu.core_type<tc>, window_params = [{transform_indices = @transform_0, window_bounds = array<i64: 16, 64>}, {transform_indices = @transform_1, window_bounds = array<i64: 64, 32>}, {pipeline_mode = #tpu.pipeline_mode<synchronous>, transform_indices = @transform_2, window_bounds = array<i64: 1, 32>}, {transform_indices = @transform_3, window_bounds = array<i64: 16, 32>}, {pipeline_mode = #tpu.pipeline_mode<synchronous>, transform_indices = @transform_4, window_bounds = array<i64: 1, 32>}, {pipeline_mode = #tpu.pipeline_mode<synchronous>, transform_indices = @transform_5, window_bounds = array<i64: 1, 32>}, {transform_indices = @transform_6, window_bounds = array<i64: 16, 32>}]} {
    %c0_i32 = arith.constant 0 : i32
    %0 = arith.cmpi eq, %arg1, %c0_i32 : i32
    %1 = arith.extui %0 : i1 to i32
    %c0_i32_0 = arith.constant 0 : i32
    %2 = arith.cmpi ne, %1, %c0_i32_0 : i32
    scf.if %2 {
      %cst_10 = arith.constant 0.000000e+00 : f32
      %12 = vector.broadcast %cst_10 : f32 to vector<16x32xf32>
      %c0_11 = arith.constant 0 : index
      %c0_12 = arith.constant 0 : index
      %13 = vector.load %arg9[%c0_11, %c0_12] : memref<16x32xf32, #tpu.memory_space<vmem>>, vector<16x32xf32>
      tpu.vector_store %arg9[%c0_11, %c0_12], %12 {strides = array<i32>} : memref<16x32xf32, #tpu.memory_space<vmem>>, vector<16x32xf32>,
    } else {
    }
    %c0 = arith.constant 0 : index
    %c0_1 = arith.constant 0 : index
    %3 = vector.load %arg9[%c0, %c0_1] : memref<16x32xf32, #tpu.memory_space<vmem>>, vector<16x32xf32>
    %c0_2 = arith.constant 0 : index
    %c0_3 = arith.constant 0 : index
    %4 = vector.load %arg2[%c0_2, %c0_3] : memref<16x64xbf16, #tpu.memory_space<vmem>>, vector<16x64xbf16>
    %c0_4 = arith.constant 0 : index
    %c0_5 = arith.constant 0 : index
    %5 = vector.load %arg3[%c0_4, %c0_5] : memref<64x32xbf16, #tpu.memory_space<vmem>>, vector<64x32xbf16>
    %cst = arith.constant dense<0.000000e+00> : vector<16x32xf32>
    %6 = tpu.matmul %4, %5, %cst {dimension_numbers = #tpu.dot_dimension_numbers<[1], [0], [0], [1], [0, 0, 1, 1], [], []>} : vector<16x64xbf16>, vector<64x32xbf16>, vector<16x32xf32> -> vector<16x32xf32>
    %7 = arith.addf %3, %6 : vector<16x32xf32>
    %c0_6 = arith.constant 0 : index
    %c0_7 = arith.constant 0 : index
    %8 = vector.load %arg9[%c0_6, %c0_7] : memref<16x32xf32, #tpu.memory_space<vmem>>, vector<16x32xf32>
    tpu.vector_store %arg9[%c0_6, %c0_7], %7 {strides = array<i32>} : memref<16x32xf32, #tpu.memory_space<vmem>>, vector<16x32xf32>,
    %c0_i32_8 = arith.constant 0 : i32
    %9 = arith.cmpi eq, %arg1, %c0_i32_8 : i32
    %10 = arith.extui %9 : i1 to i32
    %c0_i32_9 = arith.constant 0 : i32
    %11 = arith.cmpi ne, %10, %c0_i32_9 : i32
    scf.if %11 {
      %c0_10 = arith.constant 0 : index
      %c0_11 = arith.constant 0 : index
      %12 = vector.load %arg9[%c0_10, %c0_11] : memref<16x32xf32, #tpu.memory_space<vmem>>, vector<16x32xf32>
      %c0_12 = arith.constant 0 : index
      %c0_13 = arith.constant 0 : index
      %13 = vector.load %arg4[%c0_12, %c0_13] : memref<1x32xf32, #tpu.memory_space<vmem>>, vector<1x32xf32>
      %14 = vector.broadcast %13 : vector<1x32xf32> to vector<16x32xf32>
      %15 = arith.addf %12, %14 : vector<16x32xf32>
      %c0_14 = arith.constant 0 : index
      %c0_15 = arith.constant 0 : index
      %16 = vector.load %arg5[%c0_14, %c0_15] : memref<16x32xbf16, #tpu.memory_space<vmem>>, vector<16x32xbf16>
      %17 = arith.extf %16 : vector<16x32xbf16> to vector<16x32xf32>
      %18 = arith.addf %15, %17 : vector<16x32xf32>
      %cst_16 = arith.constant dense<0.000000e+00> : vector<16xf32>
      %19 = vector.multi_reduction <add>, %18, %cst_16 [1] : vector<16x32xf32> to vector<16xf32>
      %20 = vector.shape_cast %19 : vector<16xf32> to vector<16x1xf32>
      %cst_17 = arith.constant 3.200000e+01 : f32
      %21 = vector.broadcast %cst_17 : f32 to vector<16x1xf32>
      %22 = arith.divf %20, %21 : vector<16x1xf32>
      %23 = vector.broadcast %22 : vector<16x1xf32> to vector<16x32xf32>
      %24 = arith.subf %18, %23 : vector<16x32xf32>
      %25 = arith.mulf %24, %24 : vector<16x32xf32>
      %cst_18 = arith.constant dense<0.000000e+00> : vector<16xf32>
      %26 = vector.multi_reduction <add>, %25, %cst_18 [1] : vector<16x32xf32> to vector<16xf32>
      %27 = vector.shape_cast %26 : vector<16xf32> to vector<16x1xf32>
      %cst_19 = arith.constant 3.200000e+01 : f32
      %28 = vector.broadcast %cst_19 : f32 to vector<16x1xf32>
      %29 = arith.divf %27, %28 : vector<16x1xf32>
      %cst_20 = arith.constant 9.99999996E-13 : f32
      %30 = vector.broadcast %cst_20 : f32 to vector<16x1xf32>
      %31 = arith.addf %29, %30 : vector<16x1xf32>
      %32 = math.rsqrt %31 : vector<16x1xf32>
      %33 = vector.broadcast %22 : vector<16x1xf32> to vector<16x32xf32>
      %34 = arith.subf %18, %33 : vector<16x32xf32>
      %35 = vector.broadcast %32 : vector<16x1xf32> to vector<16x32xf32>
      %36 = arith.mulf %34, %35 : vector<16x32xf32>
      %c0_21 = arith.constant 0 : index
      %c0_22 = arith.constant 0 : index
      %37 = vector.load %arg6[%c0_21, %c0_22] : memref<1x32xf32, #tpu.memory_space<vmem>>, vector<1x32xf32>
      %38 = vector.broadcast %37 : vector<1x32xf32> to vector<16x32xf32>
      %39 = arith.mulf %36, %38 : vector<16x32xf32>
      %c0_23 = arith.constant 0 : index
      %c0_24 = arith.constant 0 : index
      %40 = vector.load %arg7[%c0_23, %c0_24] : memref<1x32xf32, #tpu.memory_space<vmem>>, vector<1x32xf32>
      %41 = vector.broadcast %40 : vector<1x32xf32> to vector<16x32xf32>
      %42 = arith.addf %39, %41 : vector<16x32xf32>
      %43 = arith.truncf %42 : vector<16x32xf32> to vector<16x32xbf16>
      %c0_25 = arith.constant 0 : index
      %c0_26 = arith.constant 0 : index
      %44 = vector.load %arg8[%c0_25, %c0_26] : memref<16x32xbf16, #tpu.memory_space<vmem>>, vector<16x32xbf16>
      tpu.vector_store %arg8[%c0_25, %c0_26], %43 {strides = array<i32>} : memref<16x32xbf16, #tpu.memory_space<vmem>>, vector<16x32xbf16>,
    } else {
    }
    return
  }
  func.func @transform_0(%arg0: i32, %arg1: i32) -> (i32, i32) {
    %c0_i32 = arith.constant 0 : i32
    return %arg0, %arg1 : i32, i32
  }
  func.func @transform_1(%arg0: i32, %arg1: i32) -> (i32, i32) {
    %c0_i32 = arith.constant 0 : i32
    %c0_i32_0 = arith.constant 0 : i32
    return %arg1, %c0_i32 : i32, i32
  }
  func.func @transform_2(%arg0: i32, %arg1: i32) -> (i32, i32) {
    %c0_i32 = arith.constant 0 : i32
    %c0_i32_0 = arith.constant 0 : i32
    %c0_i32_1 = arith.constant 0 : i32
    return %c0_i32, %c0_i32_0 : i32, i32
  }
  func.func @transform_3(%arg0: i32, %arg1: i32) -> (i32, i32) {
    %c0_i32 = arith.constant 0 : i32
    %c0_i32_0 = arith.constant 0 : i32
    return %arg0, %c0_i32 : i32, i32
  }
  func.func @transform_4(%arg0: i32, %arg1: i32) -> (i32, i32) {
    %c0_i32 = arith.constant 0 : i32
    %c0_i32_0 = arith.constant 0 : i32
    %c0_i32_1 = arith.constant 0 : i32
    return %c0_i32, %c0_i32_0 : i32, i32
  }
  func.func @transform_5(%arg0: i32, %arg1: i32) -> (i32, i32) {
    %c0_i32 = arith.constant 0 : i32
    %c0_i32_0 = arith.constant 0 : i32
    %c0_i32_1 = arith.constant 0 : i32
    return %c0_i32, %c0_i32_0 : i32, i32
  }
  func.func @transform_6(%arg0: i32, %arg1: i32) -> (i32, i32) {
    %c0_i32 = arith.constant 0 : i32
    %c0_i32_0 = arith.constant 0 : i32
    return %arg0, %c0_i32 : i32, i32
  }
}

module attributes {stable_mosaic.version = 11 : i64} {
  func.func @_cross_attn_kernel(%arg0: i32, %arg1: memref<1x8x32xbf16, #tpu.memory_space<vmem>>, %arg2: memref<1x8x64xbf16, #tpu.memory_space<vmem>>, %arg3: memref<1x8x8xf32, #tpu.memory_space<vmem>>, %arg4: memref<1x8x32xbf16, #tpu.memory_space<vmem>>) attributes {dimension_semantics = [#tpu.dimension_semantics<parallel>], iteration_bounds = array<i64: 2>, scalar_prefetch = 0 : i64, scratch_operands = 0 : i64, tpu.core_type = #tpu.core_type<tc>, window_params = [{transform_indices = @transform_0, window_bounds = array<i64: 1, 8, 32>}, {transform_indices = @transform_1, window_bounds = array<i64: 1, 8, 64>}, {transform_indices = @transform_2, window_bounds = array<i64: 1, 8, 8>}, {transform_indices = @transform_3, window_bounds = array<i64: 1, 8, 32>}]} {
    %c0 = arith.constant 0 : index
    %c0_0 = arith.constant 0 : index
    %c0_1 = arith.constant 0 : index
    %0 = vector.load %arg2[%c0, %c0_0, %c0_1] : memref<1x8x64xbf16, #tpu.memory_space<vmem>>, vector<1x8x64xbf16>
    %1 = vector.shape_cast %0 : vector<1x8x64xbf16> to vector<8x64xbf16>
    %c0_2 = arith.constant 0 : index
    %c0_3 = arith.constant 0 : index
    %c0_4 = arith.constant 0 : index
    %2 = vector.load %arg1[%c0_2, %c0_3, %c0_4] : memref<1x8x32xbf16, #tpu.memory_space<vmem>>, vector<1x8x32xbf16>
    %3 = vector.shape_cast %2 : vector<1x8x32xbf16> to vector<8x32xbf16>
    %4 = vector.extract_strided_slice %1 {offsets = [0, 0], sizes = [8, 32], strides = [1, 1]} : vector<8x64xbf16> to vector<8x32xbf16>
    %5 = vector.extract_strided_slice %1 {offsets = [0, 32], sizes = [8, 32], strides = [1, 1]} : vector<8x64xbf16> to vector<8x32xbf16>
    %c0_5 = arith.constant 0 : index
    %c0_6 = arith.constant 0 : index
    %c0_7 = arith.constant 0 : index
    %6 = vector.load %arg3[%c0_5, %c0_6, %c0_7] : memref<1x8x8xf32, #tpu.memory_space<vmem>>, vector<1x8x8xf32>
    %7 = vector.shape_cast %6 : vector<1x8x8xf32> to vector<8x8xf32>
    %8 = vector.extract_strided_slice %3 {offsets = [0, 0], sizes = [8, 8], strides = [1, 1]} : vector<8x32xbf16> to vector<8x8xbf16>
    %9 = vector.extract_strided_slice %4 {offsets = [0, 0], sizes = [8, 8], strides = [1, 1]} : vector<8x32xbf16> to vector<8x8xbf16>
    %10 = tpu.transpose %9, [1, 0] : vector<8x8xbf16> -> vector<8x8xbf16>
    %cst = arith.constant dense<0.000000e+00> : vector<8x8xf32>
    %11 = tpu.matmul %8, %10, %cst {dimension_numbers = #tpu.dot_dimension_numbers<[1], [0], [0], [1], [0, 0, 1, 1], [], []>} : vector<8x8xbf16>, vector<8x8xbf16>, vector<8x8xf32> -> vector<8x8xf32>
    %cst_8 = arith.constant 0.353553385 : f32
    %12 = vector.broadcast %cst_8 : f32 to vector<8x8xf32>
    %13 = arith.mulf %11, %12 : vector<8x8xf32>
    %cst_9 = arith.constant 0.000000e+00 : f32
    %14 = vector.broadcast %cst_9 : f32 to vector<8x8xf32>
    %15 = arith.cmpf oeq, %7, %14 : vector<8x8xf32>
    %cst_10 = arith.constant -1.000000e+04 : f32
    %16 = vector.broadcast %cst_10 : f32 to vector<8x8xf32>
    %17 = arith.select %15, %16, %13 : vector<8x8xi1>, vector<8x8xf32>
    %cst_11 = arith.constant dense<0xFF800000> : vector<8xf32>
    %18 = vector.multi_reduction <maximumf>, %17, %cst_11 [1] : vector<8x8xf32> to vector<8xf32>
    %19 = vector.shape_cast %18 : vector<8xf32> to vector<8x1xf32>
    %20 = vector.broadcast %19 : vector<8x1xf32> to vector<8x8xf32>
    %21 = arith.subf %17, %20 : vector<8x8xf32>
    %22 = math.exp %21 : vector<8x8xf32>
    %cst_12 = arith.constant dense<0.000000e+00> : vector<8xf32>
    %23 = vector.multi_reduction <add>, %22, %cst_12 [1] : vector<8x8xf32> to vector<8xf32>
    %24 = vector.shape_cast %23 : vector<8xf32> to vector<8x1xf32>
    %25 = tpu.reciprocal %24 {approx = true} : vector<8x1xf32> -> vector<8x1xf32>
    %26 = vector.broadcast %25 : vector<8x1xf32> to vector<8x8xf32>
    %27 = arith.mulf %22, %26 : vector<8x8xf32>
    %28 = arith.truncf %27 : vector<8x8xf32> to vector<8x8xbf16>
    %29 = vector.extract_strided_slice %5 {offsets = [0, 0], sizes = [8, 8], strides = [1, 1]} : vector<8x32xbf16> to vector<8x8xbf16>
    %cst_13 = arith.constant dense<0.000000e+00> : vector<8x8xf32>
    %30 = tpu.matmul %28, %29, %cst_13 {dimension_numbers = #tpu.dot_dimension_numbers<[1], [0], [0], [1], [0, 0, 1, 1], [], []>} : vector<8x8xbf16>, vector<8x8xbf16>, vector<8x8xf32> -> vector<8x8xf32>
    %31 = vector.extract_strided_slice %3 {offsets = [0, 8], sizes = [8, 8], strides = [1, 1]} : vector<8x32xbf16> to vector<8x8xbf16>
    %32 = vector.extract_strided_slice %4 {offsets = [0, 8], sizes = [8, 8], strides = [1, 1]} : vector<8x32xbf16> to vector<8x8xbf16>
    %33 = tpu.transpose %32, [1, 0] : vector<8x8xbf16> -> vector<8x8xbf16>
    %cst_14 = arith.constant dense<0.000000e+00> : vector<8x8xf32>
    %34 = tpu.matmul %31, %33, %cst_14 {dimension_numbers = #tpu.dot_dimension_numbers<[1], [0], [0], [1], [0, 0, 1, 1], [], []>} : vector<8x8xbf16>, vector<8x8xbf16>, vector<8x8xf32> -> vector<8x8xf32>
    %cst_15 = arith.constant 0.353553385 : f32
    %35 = vector.broadcast %cst_15 : f32 to vector<8x8xf32>
    %36 = arith.mulf %34, %35 : vector<8x8xf32>
    %cst_16 = arith.constant 0.000000e+00 : f32
    %37 = vector.broadcast %cst_16 : f32 to vector<8x8xf32>
    %38 = arith.cmpf oeq, %7, %37 : vector<8x8xf32>
    %cst_17 = arith.constant -1.000000e+04 : f32
    %39 = vector.broadcast %cst_17 : f32 to vector<8x8xf32>
    %40 = arith.select %38, %39, %36 : vector<8x8xi1>, vector<8x8xf32>
    %cst_18 = arith.constant dense<0xFF800000> : vector<8xf32>
    %41 = vector.multi_reduction <maximumf>, %40, %cst_18 [1] : vector<8x8xf32> to vector<8xf32>
    %42 = vector.shape_cast %41 : vector<8xf32> to vector<8x1xf32>
    %43 = vector.broadcast %42 : vector<8x1xf32> to vector<8x8xf32>
    %44 = arith.subf %40, %43 : vector<8x8xf32>
    %45 = math.exp %44 : vector<8x8xf32>
    %cst_19 = arith.constant dense<0.000000e+00> : vector<8xf32>
    %46 = vector.multi_reduction <add>, %45, %cst_19 [1] : vector<8x8xf32> to vector<8xf32>
    %47 = vector.shape_cast %46 : vector<8xf32> to vector<8x1xf32>
    %48 = tpu.reciprocal %47 {approx = true} : vector<8x1xf32> -> vector<8x1xf32>
    %49 = vector.broadcast %48 : vector<8x1xf32> to vector<8x8xf32>
    %50 = arith.mulf %45, %49 : vector<8x8xf32>
    %51 = arith.truncf %50 : vector<8x8xf32> to vector<8x8xbf16>
    %52 = vector.extract_strided_slice %5 {offsets = [0, 8], sizes = [8, 8], strides = [1, 1]} : vector<8x32xbf16> to vector<8x8xbf16>
    %cst_20 = arith.constant dense<0.000000e+00> : vector<8x8xf32>
    %53 = tpu.matmul %51, %52, %cst_20 {dimension_numbers = #tpu.dot_dimension_numbers<[1], [0], [0], [1], [0, 0, 1, 1], [], []>} : vector<8x8xbf16>, vector<8x8xbf16>, vector<8x8xf32> -> vector<8x8xf32>
    %54 = vector.extract_strided_slice %3 {offsets = [0, 16], sizes = [8, 8], strides = [1, 1]} : vector<8x32xbf16> to vector<8x8xbf16>
    %55 = vector.extract_strided_slice %4 {offsets = [0, 16], sizes = [8, 8], strides = [1, 1]} : vector<8x32xbf16> to vector<8x8xbf16>
    %56 = tpu.transpose %55, [1, 0] : vector<8x8xbf16> -> vector<8x8xbf16>
    %cst_21 = arith.constant dense<0.000000e+00> : vector<8x8xf32>
    %57 = tpu.matmul %54, %56, %cst_21 {dimension_numbers = #tpu.dot_dimension_numbers<[1], [0], [0], [1], [0, 0, 1, 1], [], []>} : vector<8x8xbf16>, vector<8x8xbf16>, vector<8x8xf32> -> vector<8x8xf32>
    %cst_22 = arith.constant 0.353553385 : f32
    %58 = vector.broadcast %cst_22 : f32 to vector<8x8xf32>
    %59 = arith.mulf %57, %58 : vector<8x8xf32>
    %cst_23 = arith.constant 0.000000e+00 : f32
    %60 = vector.broadcast %cst_23 : f32 to vector<8x8xf32>
    %61 = arith.cmpf oeq, %7, %60 : vector<8x8xf32>
    %cst_24 = arith.constant -1.000000e+04 : f32
    %62 = vector.broadcast %cst_24 : f32 to vector<8x8xf32>
    %63 = arith.select %61, %62, %59 : vector<8x8xi1>, vector<8x8xf32>
    %cst_25 = arith.constant dense<0xFF800000> : vector<8xf32>
    %64 = vector.multi_reduction <maximumf>, %63, %cst_25 [1] : vector<8x8xf32> to vector<8xf32>
    %65 = vector.shape_cast %64 : vector<8xf32> to vector<8x1xf32>
    %66 = vector.broadcast %65 : vector<8x1xf32> to vector<8x8xf32>
    %67 = arith.subf %63, %66 : vector<8x8xf32>
    %68 = math.exp %67 : vector<8x8xf32>
    %cst_26 = arith.constant dense<0.000000e+00> : vector<8xf32>
    %69 = vector.multi_reduction <add>, %68, %cst_26 [1] : vector<8x8xf32> to vector<8xf32>
    %70 = vector.shape_cast %69 : vector<8xf32> to vector<8x1xf32>
    %71 = tpu.reciprocal %70 {approx = true} : vector<8x1xf32> -> vector<8x1xf32>
    %72 = vector.broadcast %71 : vector<8x1xf32> to vector<8x8xf32>
    %73 = arith.mulf %68, %72 : vector<8x8xf32>
    %74 = arith.truncf %73 : vector<8x8xf32> to vector<8x8xbf16>
    %75 = vector.extract_strided_slice %5 {offsets = [0, 16], sizes = [8, 8], strides = [1, 1]} : vector<8x32xbf16> to vector<8x8xbf16>
    %cst_27 = arith.constant dense<0.000000e+00> : vector<8x8xf32>
    %76 = tpu.matmul %74, %75, %cst_27 {dimension_numbers = #tpu.dot_dimension_numbers<[1], [0], [0], [1], [0, 0, 1, 1], [], []>} : vector<8x8xbf16>, vector<8x8xbf16>, vector<8x8xf32> -> vector<8x8xf32>
    %77 = vector.extract_strided_slice %3 {offsets = [0, 24], sizes = [8, 8], strides = [1, 1]} : vector<8x32xbf16> to vector<8x8xbf16>
    %78 = vector.extract_strided_slice %4 {offsets = [0, 24], sizes = [8, 8], strides = [1, 1]} : vector<8x32xbf16> to vector<8x8xbf16>
    %79 = tpu.transpose %78, [1, 0] : vector<8x8xbf16> -> vector<8x8xbf16>
    %cst_28 = arith.constant dense<0.000000e+00> : vector<8x8xf32>
    %80 = tpu.matmul %77, %79, %cst_28 {dimension_numbers = #tpu.dot_dimension_numbers<[1], [0], [0], [1], [0, 0, 1, 1], [], []>} : vector<8x8xbf16>, vector<8x8xbf16>, vector<8x8xf32> -> vector<8x8xf32>
    %cst_29 = arith.constant 0.353553385 : f32
    %81 = vector.broadcast %cst_29 : f32 to vector<8x8xf32>
    %82 = arith.mulf %80, %81 : vector<8x8xf32>
    %cst_30 = arith.constant 0.000000e+00 : f32
    %83 = vector.broadcast %cst_30 : f32 to vector<8x8xf32>
    %84 = arith.cmpf oeq, %7, %83 : vector<8x8xf32>
    %cst_31 = arith.constant -1.000000e+04 : f32
    %85 = vector.broadcast %cst_31 : f32 to vector<8x8xf32>
    %86 = arith.select %84, %85, %82 : vector<8x8xi1>, vector<8x8xf32>
    %cst_32 = arith.constant dense<0xFF800000> : vector<8xf32>
    %87 = vector.multi_reduction <maximumf>, %86, %cst_32 [1] : vector<8x8xf32> to vector<8xf32>
    %88 = vector.shape_cast %87 : vector<8xf32> to vector<8x1xf32>
    %89 = vector.broadcast %88 : vector<8x1xf32> to vector<8x8xf32>
    %90 = arith.subf %86, %89 : vector<8x8xf32>
    %91 = math.exp %90 : vector<8x8xf32>
    %cst_33 = arith.constant dense<0.000000e+00> : vector<8xf32>
    %92 = vector.multi_reduction <add>, %91, %cst_33 [1] : vector<8x8xf32> to vector<8xf32>
    %93 = vector.shape_cast %92 : vector<8xf32> to vector<8x1xf32>
    %94 = tpu.reciprocal %93 {approx = true} : vector<8x1xf32> -> vector<8x1xf32>
    %95 = vector.broadcast %94 : vector<8x1xf32> to vector<8x8xf32>
    %96 = arith.mulf %91, %95 : vector<8x8xf32>
    %97 = arith.truncf %96 : vector<8x8xf32> to vector<8x8xbf16>
    %98 = vector.extract_strided_slice %5 {offsets = [0, 24], sizes = [8, 8], strides = [1, 1]} : vector<8x32xbf16> to vector<8x8xbf16>
    %cst_34 = arith.constant dense<0.000000e+00> : vector<8x8xf32>
    %99 = tpu.matmul %97, %98, %cst_34 {dimension_numbers = #tpu.dot_dimension_numbers<[1], [0], [0], [1], [0, 0, 1, 1], [], []>} : vector<8x8xbf16>, vector<8x8xbf16>, vector<8x8xf32> -> vector<8x8xf32>
    %100 = tpu.concatenate %30, %53, %76, %99 in 1 : vector<8x8xf32>, vector<8x8xf32>, vector<8x8xf32>, vector<8x8xf32> -> vector<8x32xf32>
    %101 = arith.truncf %100 : vector<8x32xf32> to vector<8x32xbf16>
    %c0_35 = arith.constant 0 : index
    %c0_36 = arith.constant 0 : index
    %c0_37 = arith.constant 0 : index
    %102 = vector.load %arg4[%c0_35, %c0_36, %c0_37] : memref<1x8x32xbf16, #tpu.memory_space<vmem>>, vector<1x8x32xbf16>
    %103 = vector.shape_cast %102 : vector<1x8x32xbf16> to vector<8x32xbf16>
    %104 = vector.shape_cast %101 : vector<8x32xbf16> to vector<1x8x32xbf16>
    tpu.vector_store %arg4[%c0_35, %c0_36, %c0_37], %104 {strides = array<i32>} : memref<1x8x32xbf16, #tpu.memory_space<vmem>>, vector<1x8x32xbf16>,
    return
  }
  func.func @transform_0(%arg0: i32) -> (i32, i32, i32) {
    %c0_i32 = arith.constant 0 : i32
    %c0_i32_0 = arith.constant 0 : i32
    %c0_i32_1 = arith.constant 0 : i32
    return %arg0, %c0_i32, %c0_i32_0 : i32, i32, i32
  }
  func.func @transform_1(%arg0: i32) -> (i32, i32, i32) {
    %c0_i32 = arith.constant 0 : i32
    %c0_i32_0 = arith.constant 0 : i32
    %c0_i32_1 = arith.constant 0 : i32
    return %arg0, %c0_i32, %c0_i32_0 : i32, i32, i32
  }
  func.func @transform_2(%arg0: i32) -> (i32, i32, i32) {
    %c0_i32 = arith.constant 0 : i32
    %c0_i32_0 = arith.constant 0 : i32
    %c0_i32_1 = arith.constant 0 : i32
    return %arg0, %c0_i32, %c0_i32_0 : i32, i32, i32
  }
  func.func @transform_3(%arg0: i32) -> (i32, i32, i32) {
    %c0_i32 = arith.constant 0 : i32
    %c0_i32_0 = arith.constant 0 : i32
    %c0_i32_1 = arith.constant 0 : i32
    return %arg0, %c0_i32, %c0_i32_0 : i32, i32, i32
  }
}

module attributes {stable_mosaic.version = 11 : i64} {
  func.func @_matmul_kernel(%arg0: i32, %arg1: i32, %arg2: i32, %arg3: memref<16x32xbf16, #tpu.memory_space<vmem>>, %arg4: memref<32x128xbf16, #tpu.memory_space<vmem>>, %arg5: memref<1x128xf32, #tpu.memory_space<vmem>>, %arg6: memref<16x128xf32, #tpu.memory_space<vmem>>, %arg7: memref<16x128xf32, #tpu.memory_space<vmem>>) attributes {dimension_semantics = [#tpu.dimension_semantics<parallel>, #tpu.dimension_semantics<parallel>, #tpu.dimension_semantics<arbitrary>], iteration_bounds = array<i64: 1, 1, 1>, scalar_prefetch = 0 : i64, scratch_operands = 1 : i64, tpu.core_type = #tpu.core_type<tc>, window_params = [{transform_indices = @transform_0, window_bounds = array<i64: 16, 32>}, {transform_indices = @transform_1, window_bounds = array<i64: 32, 128>}, {transform_indices = @transform_2, window_bounds = array<i64: 1, 128>}, {transform_indices = @transform_3, window_bounds = array<i64: 16, 128>}]} {
    %c0_i32 = arith.constant 0 : i32
    %0 = arith.cmpi eq, %arg2, %c0_i32 : i32
    %1 = arith.extui %0 : i1 to i32
    %c0_i32_0 = arith.constant 0 : i32
    %2 = arith.cmpi ne, %1, %c0_i32_0 : i32
    scf.if %2 {
      %cst_10 = arith.constant 0.000000e+00 : f32
      %12 = vector.broadcast %cst_10 : f32 to vector<16x128xf32>
      %c0_11 = arith.constant 0 : index
      %c0_12 = arith.constant 0 : index
      %13 = vector.load %arg7[%c0_11, %c0_12] : memref<16x128xf32, #tpu.memory_space<vmem>>, vector<16x128xf32>
      tpu.vector_store %arg7[%c0_11, %c0_12], %12 {strides = array<i32>} : memref<16x128xf32, #tpu.memory_space<vmem>>, vector<16x128xf32>,
    } else {
    }
    %c0 = arith.constant 0 : index
    %c0_1 = arith.constant 0 : index
    %3 = vector.load %arg7[%c0, %c0_1] : memref<16x128xf32, #tpu.memory_space<vmem>>, vector<16x128xf32>
    %c0_2 = arith.constant 0 : index
    %c0_3 = arith.constant 0 : index
    %4 = vector.load %arg3[%c0_2, %c0_3] : memref<16x32xbf16, #tpu.memory_space<vmem>>, vector<16x32xbf16>
    %c0_4 = arith.constant 0 : index
    %c0_5 = arith.constant 0 : index
    %5 = vector.load %arg4[%c0_4, %c0_5] : memref<32x128xbf16, #tpu.memory_space<vmem>>, vector<32x128xbf16>
    %cst = arith.constant dense<0.000000e+00> : vector<16x128xf32>
    %6 = tpu.matmul %4, %5, %cst {dimension_numbers = #tpu.dot_dimension_numbers<[1], [0], [0], [1], [0, 0, 1, 1], [], []>} : vector<16x32xbf16>, vector<32x128xbf16>, vector<16x128xf32> -> vector<16x128xf32>
    %7 = arith.addf %3, %6 : vector<16x128xf32>
    %c0_6 = arith.constant 0 : index
    %c0_7 = arith.constant 0 : index
    %8 = vector.load %arg7[%c0_6, %c0_7] : memref<16x128xf32, #tpu.memory_space<vmem>>, vector<16x128xf32>
    tpu.vector_store %arg7[%c0_6, %c0_7], %7 {strides = array<i32>} : memref<16x128xf32, #tpu.memory_space<vmem>>, vector<16x128xf32>,
    %c0_i32_8 = arith.constant 0 : i32
    %9 = arith.cmpi eq, %arg2, %c0_i32_8 : i32
    %10 = arith.extui %9 : i1 to i32
    %c0_i32_9 = arith.constant 0 : i32
    %11 = arith.cmpi ne, %10, %c0_i32_9 : i32
    scf.if %11 {
      %c0_10 = arith.constant 0 : index
      %c0_11 = arith.constant 0 : index
      %12 = vector.load %arg7[%c0_10, %c0_11] : memref<16x128xf32, #tpu.memory_space<vmem>>, vector<16x128xf32>
      %c0_12 = arith.constant 0 : index
      %c0_13 = arith.constant 0 : index
      %13 = vector.load %arg5[%c0_12, %c0_13] : memref<1x128xf32, #tpu.memory_space<vmem>>, vector<1x128xf32>
      %14 = vector.broadcast %13 : vector<1x128xf32> to vector<16x128xf32>
      %15 = arith.addf %12, %14 : vector<16x128xf32>
      %c0_14 = arith.constant 0 : index
      %c0_15 = arith.constant 0 : index
      %16 = vector.load %arg6[%c0_14, %c0_15] : memref<16x128xf32, #tpu.memory_space<vmem>>, vector<16x128xf32>
      tpu.vector_store %arg6[%c0_14, %c0_15], %15 {strides = array<i32>} : memref<16x128xf32, #tpu.memory_space<vmem>>, vector<16x128xf32>,
    } else {
    }
    return
  }
  func.func @transform_0(%arg0: i32, %arg1: i32, %arg2: i32) -> (i32, i32) {
    %c0_i32 = arith.constant 0 : i32
    return %arg0, %arg2 : i32, i32
  }
  func.func @transform_1(%arg0: i32, %arg1: i32, %arg2: i32) -> (i32, i32) {
    %c0_i32 = arith.constant 0 : i32
    return %arg2, %arg1 : i32, i32
  }
  func.func @transform_2(%arg0: i32, %arg1: i32, %arg2: i32) -> (i32, i32) {
    %c0_i32 = arith.constant 0 : i32
    %c0_i32_0 = arith.constant 0 : i32
    return %c0_i32, %arg1 : i32, i32
  }
  func.func @transform_3(%arg0: i32, %arg1: i32, %arg2: i32) -> (i32, i32) {
    %c0_i32 = arith.constant 0 : i32
    return %arg0, %arg1 : i32, i32
  }
}

</mosaic_0001>

<bundles_post_ra>
// kernel: decoder_forward.19
= control target key start
LH: loop header
LB: loop body
LE: loop exit
PB: predicated region body
PF: predicated region fallthrough
CT: control target
= control target key end

     0   :  { %vm19_vm0 = vcmask 785408   ;;  %v151_v0 = vmov 0.0   ;;  %vm152_vm1 = vmmov 0   ;;  %vm47_vm2 = vcmask 261120   ;;  %s195_s1 = inlined_call_operand.vmem [shape: bf16[32,96], index: 1, kind: input, shape index: {}]   ;;  %s196_s0 = inlined_call_operand.vmem [shape: bf16[16,32], index: 0, kind: input, shape index: {}]   ;;  %s197_s2 = inlined_call_operand.vmem [shape: f32[1,96], index: 2, kind: input, shape index: {}]   ;;  %s198_s3 = inlined_call_operand.vmem [shape: bf16[16,96], index: 3, kind: output, shape index: {}]  }
   0x1   :  { %138 = vmatprep.subr.bf16.mxu0 %v151_v0  ;;  %v148_v1 = vld [vmem:[%s195_s1] sm:$0xff]   ;;  %142 = vmatprep.mubr.msk.bf16.mxu0 %vm152_vm1, %v151_v0  ;;  %20 = vst.msk [vmem:[#allocation2] sm:$0xff] %vm19_vm0, %v151_v0  ;;  %21 = vst.msk [vmem:[#allocation2 + $0x8] sm:$0xff] %vm19_vm0, %v151_v0  ;;  %v149_v2 = vld [vmem:[%s195_s1 + $0x8] sm:$0xff]   ;;  %vm119_vm3 = vcmask 781312  }
   0x2   :  { %139 = vmatpush3.bf16.msra.mxu0 %v148_v1  ;;  %v150_v3 = vld [vmem:[%s196_s0] sm:$0xff]  }
   0x3   :  { %140 = vmatprep.subr.bf16.mxu0 %v151_v0  ;;  %v130_v12 = vld [vmem:[%s197_s2] ss:$0 sm:$0xff] }
   0x6   :  { %141 = vmatpush3.bf16.msra.mxu0 %v149_v2 }
   0x8   :  { %v22_v4 = vld [vmem:[#allocation2] sm:$0xff]  ;;  %v23_v6 = vld [vmem:[#allocation2 + $0x8] sm:$0xff] }
   0x9   :  { %143 = vmatmul.mubr.msk.bf16.vlgmr.msra.gmra.mrb[0].mxu0 %vm47_vm2, %v150_v3 }
  0xdc   :  { %v85_v5 = vpop.f32.mrb[0].mxu0 }
  0xdd   :  { %v92_v7 = vadd.f32 %v85_v5, %v22_v4  ;;  %v144_v8 = vpop.f32.mrb[1].mxu0 }
  0xde   :  { %v88_v9 = vpop.f32.mrb[2].mxu0 }
  0xdf   :  { %95 = vst.msk [vmem:[#allocation2] sm:$0xff] %vm19_vm0, %v92_v7  ;;  %v93_v10 = vadd.f32 %v88_v9, %v23_v6  ;;  %v145_v11 = vpop.f32.mrb[3].mxu0 }
  0xe1   :  { %96 = vst.msk [vmem:[#allocation2 + $0x8] sm:$0xff] %vm19_vm0, %v93_v10 }
  0xe6   :  { %v100_v13 = vld [vmem:[#allocation2] sm:$0xff] }
  0xe7   :  { %v109_v14 = vadd.f32 %v130_v12, %v100_v13 }
  0xe8   :  { %v101_v15 = vld [vmem:[#allocation2 + $0x8] sm:$0xff] }
  0xe9   :  { %v133_v16 = vpack.c.bf16 %v109_v14, %v109_v14  ;;  %v110_v17 = vadd.f32 %v130_v12, %v101_v15 }
  0xeb   :  { %120 = vst.msk [vmem:[%s198_s3] sm:$0xf] %vm119_vm3, %v133_v16  ;;  %v134_v18 = vpack.c.bf16 %v110_v17, %v110_v17 }
  0xed   :  { %121 = vst.msk [vmem:[%s198_s3 + $0x4] sm:$0xf] %vm119_vm3, %v134_v18 }

// kernel: decoder_forward.20
= control target key start
LH: loop header
LB: loop body
LE: loop exit
PB: predicated region body
PF: predicated region fallthrough
CT: control target
= control target key end

     0   :  { %s859_s9 = smov 0   ;;  %s963_s0 = inlined_call_operand.vmem [shape: bf16[2,8,96], index: 0, kind: input, shape index: {}]   ;;  %s964_s1 = inlined_call_operand.vmem [shape: f32[2,8,8], index: 1, kind: input, shape index: {}]   ;;  %s965_s2 = inlined_call_operand.vmem [shape: bf16[2,8,32], index: 2, kind: output, shape index: {}]  }
   0x1 LB: > { %s696_s10 = sadd.s32 4294967295, %s826_s9   ;;  %p700_p0 = scmp.ge.s32.totalorder %s826_s9, 1  ;;  %s826_s9 = sphi %s859_s9, %s12_s9  }
   0x2   : > { %p120_p1 = scmp.lt.s32.totalorder %s826_s9, 3 }
   0x4   : > { %p121_p2 = pnand %p700_p0, %p120_p1 }
   0x5   : > { %p144_p3 = scmp.lt.s32.totalorder (!%p121_p2), %s696_s10, 1  ;;  %v828_v0 = vmov (!%p121_p2), 0.0   ;;  %vm829_vm0 = vmmov (!%p121_p2), 0   ;;  %s830_s15 = smov (!%p121_p2), 96   ;;  %vm164_vm1 = vcmask (!%p121_p2), 64512   ;;  %vm231_vm3 = vcmask (!%p121_p2), 1043456  }
   0x6   : > { %124 = sbr.rel (%p121_p2) target bundleno = 1604 (0x644), region = 28  ;;  %731 = vmatprep.subr.bf16.mxu0 (!%p121_p2), %v828_v0  ;;  %733 = vmatprep.mubr.msk.bf16.mxu0 (!%p121_p2), %vm829_vm0, %v828_v0  ;;  %s831_s16 = smov (!%p121_p2), 64   ;;  %vm624_vm4 = vcmask (!%p121_p2), 130048   ;;  %vm626_vm5 = vcmask (!%p121_p2), 195584   ;;  %vm629_vm6 = vcmask (!%p121_p2), 257024  }
   0x7   : > { %737 = vmatprep.subr.bf16.mxu1 (!%p121_p2), %v828_v0  ;;  %739 = vmatprep.mubr.msk.bf16.mxu1 (!%p121_p2), %vm829_vm0, %v828_v0  ;;  %s832_s17 = smov (!%p121_p2), 88   ;;  %s833_s22 = smov (!%p121_p2), 72  }
   0x8   : > { %s834_s23 = smov (!%p121_p2), 120   ;;  %s835_s24 = smov (!%p121_p2), 80  }
   0x9   : > { %s836_s25 = smov (!%p121_p2), 112   ;;  %s837_s26 = smov (!%p121_p2), 104  }
   0xa   : > { %s838_s27 = smov (!%p121_p2), 56   ;;  %s839_s28 = smov (!%p121_p2), 48  }
   0xb   : > { %s840_s29 = smov (!%p121_p2), 40   ;;  %s841_s30 = smov (!%p121_p2), 8  }
   0xc   : > { %s842_s3 = smov (!%p121_p2), 16   ;;  %s843_s4 = smov (!%p121_p2), 24  }
   0xd   : > { %s967_s10 = smov (!%p144_p3, %s696_s10), 1 }
   0xe   : > { %s701_s11 = sshll.u32 %s967_s10, 2  ;;  %s702_s18 = sshll.u32 %s967_s10, 3 }
   0xf   : > { %s147_s14 = scalar_lea.vmem %s963_s0, %s701_s11  ;;  %s151_s21 = scalar_lea.vmem %s964_s1, %s702_s18 }
  0x10   : > { %v157_v1 = vld [vmem:[%s147_s14] sm:$0xf]  ;;  %s155_s7 = scalar_lea.vmem %s965_s2, %s701_s11 }
  0x11   : > { %v881_v2 = vcombine.low %v157_v1, %v157_v1  ;;  %v895_v5 = vld [vmem:[%s151_s21] sm:$0xff] }
  0x12   : > { %vm212_vm2 = vcmp.eq.f32.partialorder %v895_v5, 0.0 }
  0x13   : > { %162 = vrot.lane.b32.xlu0 %v881_v2, %s830_s15  ;;  %226 = vrot.lane.b32.xlu1 %v881_v2, %s831_s16 }
  0x17   : > { %277 = vrot.lane.b32.xlu1 %v881_v2, %s832_s17 }
  0x85   : > { %v163_v3 = vpop.permute.xlu0 %162  ;;  %v227_v13 = vpop.permute.xlu1 %226 }
  0x86   : > { %v169_v4 = vsel %vm164_vm1, %v163_v3, 0  ;;  %v233_v14 = vsel %vm231_vm3, %v227_v13, 0 }
  0x87   : > { %732 = vmatpush3.bf16.xpose.msra.mxu0 %v169_v4  ;;  %738 = vmatpush3.bf16.msra.mxu1 %v233_v14 }
  0x88   : > { %749 = vmatprep.subr.bf16.mxu0 %v828_v0  ;;  %743 = vmatprep.subr.bf16.mxu1 %v828_v0 }
  0x89   : > { %v278_v20 = vpop.permute.xlu1 %277 }
  0x8a   : > { %v283_v26 = vsel %vm164_vm1, %v278_v20, 0 }
  0x8e   : > { %734 = vmatmul.mubr.msk.bf16.vlgmr.msra.gmra.mrb[0].mxu0 %vm164_vm1, %v157_v1 }
  0x8f   : > { %751 = vmatprep.mubr.msk.bf16.mxu0 %vm829_vm0, %v828_v0 }
 0x161   : > { %v205_v6 = vpop.f32.mrb[0].mxu0 }
 0x162   : > { %v211_v7 = vmul.f32 0.35355338, %v205_v6  ;;  %v735_v8 = vpop.f32.mrb[1].mxu0 }
 0x163   : > { %v208_v9 = vpop.f32.mrb[2].mxu0 }
 0x164   : > { %v736_v10 = vpop.f32.mrb[3].mxu0  ;;  %v213_v11 = vsel %vm212_vm2, -10000.0, %v211_v7 }
 0x165   : > { %v214_v12 = vsel %vm164_vm1, %v213_v11, -inf }
 0x166   : > { %215 = vmax.xlane.f32.xlu0 %v214_v12 }
 0x17c   : > { %501 = vrot.lane.b32.xlu0 %v881_v2, %s833_s22 }
 0x1f3   : > { %v216_v15 = vpop.xlane.xlu0 %215 }
 0x1f4   : > { %v217_v16 = vsub.f32 %v213_v11, %v216_v15 }
 0x1f6   : > { %v218_v17 = vmul.f32 1.442695, %v217_v16 }
 0x1f7   : > { %v502_v29 = vpop.permute.xlu0 %501 }
 0x1f8   : > { %804 = vpow2.f32 %v218_v17  ;;  %v507_v31 = vsel %vm164_vm1, %v502_v29, 0 }
 0x202   : > { %v805_v18 = vpop.eup %804 }
 0x203   : > { %v220_v19 = vsel %vm164_vm1, %v805_v18, 0.0 }
 0x204   : > { %221 = vadd.xlane.f32.xlu1 %v220_v19 }
 0x215   : > { %275 = vrot.lane.b32.xlu1 %v881_v2, %s834_s23 }
 0x219   : > { %389 = vrot.lane.b32.xlu1 %v881_v2, %s835_s24 }
 0x21d   : > { %387 = vrot.lane.b32.xlu1 %v881_v2, %s836_s25 }
 0x221   : > { %499 = vrot.lane.b32.xlu1 %v881_v2, %s837_s26 }
 0x291   : > { %v222_v21 = vpop.xlane.xlu1 %221 }
 0x292   : > { %806 = vrcp.f32 %v222_v21 }
 0x295   : > { %v276_v24 = vpop.permute.xlu1 %275 }
 0x299   : > { %v390_v27 = vpop.permute.xlu1 %389 }
 0x29a   : > { %v395_v28 = vsel %vm164_vm1, %v390_v27, 0 }
 0x29c   : > { %v807_v22 = vpop.eup %806 }
 0x29d   : > { %v224_v23 = vmul.f32 %v807_v22, %v805_v18  ;;  %v388_v30 = vpop.permute.xlu1 %387 }
 0x29f   : > { %v225_v25 = vpack.c.bf16 %v224_v23, %v224_v23 }
 0x2a1   : > { %740 = vmatmul.mubr.msk.bf16.vlgmr.msra.gmra.mrb[0].mxu1 %vm164_vm1, %v225_v25  ;;  %v500_v32 = vpop.permute.xlu1 %499 }
 0x2a2   : > { %744 = vmatpush3.bf16.xpose.msra.mxu1 %v283_v26  ;;  %745 = vmatprep.mubr.msk.bf16.mxu1 %vm829_vm0, %v828_v0 }
 0x2a3   : > { %755 = vmatprep.subr.bf16.mxu1 %v828_v0 }
 0x2a9   : > { %746 = vmatmul.mubr.msk.bf16.vlgmr.msra.gmra.mrb[4].mxu1 %vm164_vm1, %v276_v24 }
 0x2aa   : > { %756 = vmatpush3.bf16.xpose.msra.mxu1 %v395_v28  ;;  %757 = vmatprep.mubr.msk.bf16.mxu1 %vm829_vm0, %v828_v0 }
 0x2ab   : > { %767 = vmatprep.subr.bf16.mxu1 %v828_v0 }
 0x2b1   : > { %758 = vmatmul.mubr.msk.bf16.vlgmr.msra.gmra.mrb[8].mxu1 %vm164_vm1, %v388_v30 }
 0x2b2   : > { %768 = vmatpush3.bf16.xpose.msra.mxu1 %v507_v31  ;;  %769 = vmatprep.mubr.msk.bf16.mxu1 %vm829_vm0, %v828_v0 }
 0x2b9   : > { %770 = vmatmul.mubr.msk.bf16.vlgmr.msra.gmra.mrb[12].mxu1 %vm164_vm1, %v500_v32 }
 0x374   : > { %v924_v33 = vpop.f32.mrb[0].mxu1 }
 0x375   : > { %v741_v34 = vpop.f32.mrb[1].mxu1 }
 0x376   : > { %v272_v35 = vpop.f32.mrb[2].mxu1 }
 0x377   : > { %v742_v36 = vpop.f32.mrb[3].mxu1 }
 0x37c   : > { %v319_v37 = vpop.f32.mrb[4].mxu1 }
 0x37d   : > { %v325_v38 = vmul.f32 0.35355338, %v319_v37  ;;  %v747_v39 = vpop.f32.mrb[5].mxu1 }
 0x37e   : > { %v322_v40 = vpop.f32.mrb[6].mxu1 }
 0x37f   : > { %v748_v41 = vpop.f32.mrb[7].mxu1  ;;  %v326_v42 = vsel %vm212_vm2, -10000.0, %v325_v38 }
 0x380   : > { %v327_v43 = vsel %vm164_vm1, %v326_v42, -inf }
 0x381   : > { %328 = vmax.xlane.f32.xlu1 %v327_v43 }
 0x384   : > { %v431_v44 = vpop.f32.mrb[8].mxu1 }
 0x385   : > { %v437_v45 = vmul.f32 0.35355338, %v431_v44  ;;  %v759_v46 = vpop.f32.mrb[9].mxu1 }
 0x386   : > { %v434_v47 = vpop.f32.mrb[10].mxu1 }
 0x387   : > { %v438_v48 = vsel %vm212_vm2, -10000.0, %v437_v45  ;;  %v760_v49 = vpop.f32.mrb[11].mxu1 }
 0x388   : > { %v439_v50 = vsel %vm164_vm1, %v438_v48, -inf }
 0x389   : > { %440 = vmax.xlane.f32.xlu0 %v439_v50 }
 0x38c   : > { %v543_v51 = vpop.f32.mrb[12].mxu1 }
 0x38d   : > { %v549_v52 = vmul.f32 0.35355338, %v543_v51  ;;  %v771_v53 = vpop.f32.mrb[13].mxu1 }
 0x38e   : > { %v546_v54 = vpop.f32.mrb[14].mxu1 }
 0x38f   : > { %v550_v55 = vsel %vm212_vm2, -10000.0, %v549_v52  ;;  %v772_v56 = vpop.f32.mrb[15].mxu1 }
 0x390   : > { %v551_v57 = vsel %vm164_vm1, %v550_v55, -inf }
 0x391   : > { %552 = vmax.xlane.f32.xlu1 %v551_v57 }
 0x40e   : > { %v329_v58 = vpop.xlane.xlu1 %328 }
 0x40f   : > { %v330_v59 = vsub.f32 %v326_v42, %v329_v58 }
 0x411   : > { %v331_v60 = vmul.f32 1.442695, %v330_v59 }
 0x413   : > { %808 = vpow2.f32 %v331_v60 }
 0x416   : > { %v441_v6 = vpop.xlane.xlu0 %440 }
 0x417   : > { %v442_v7 = vsub.f32 %v438_v48, %v441_v6 }
 0x419   : > { %v443_v8 = vmul.f32 1.442695, %v442_v7 }
 0x41d   : > { %v809_v61 = vpop.eup %808 }
 0x41e   : > { %v553_v62 = vpop.xlane.xlu1 %552  ;;  %v333_v63 = vsel %vm164_vm1, %v809_v61, 0.0 }
 0x41f   : > { %v554_v1 = vsub.f32 %v550_v55, %v553_v62  ;;  %334 = vadd.xlane.f32.xlu1 %v333_v63 }
 0x421   : > { %v555_v3 = vmul.f32 1.442695, %v554_v1 }
 0x423   : > { %810 = vpow2.f32 %v555_v3 }
 0x424   : > { %812 = vpow2.f32 %v443_v8 }
 0x42d   : > { %v811_v4 = vpop.eup %810 }
 0x42e   : > { %v557_v5 = vsel %vm164_vm1, %v811_v4, 0.0  ;;  %v813_v9 = vpop.eup %812 }
 0x42f   : > { %558 = vadd.xlane.f32.xlu0 %v557_v5  ;;  %v445_v10 = vsel %vm164_vm1, %v813_v9, 0.0 }
 0x430   : > { %339 = vrot.lane.b32.xlu1 %v881_v2, %s838_s27 }
 0x445   : > { %451 = vrot.lane.b32.xlu0 %v881_v2, %s839_s28 }
 0x454   : > { %446 = vadd.xlane.f32.xlu1 %v445_v10 }
 0x465   : > { %563 = vrot.lane.b32.xlu1 %v881_v2, %s840_s29 }
 0x4ac   : > { %v335_v11 = vpop.xlane.xlu1 %334 }
 0x4ad   : > { %814 = vrcp.f32 %v335_v11 }
 0x4b0   : > { %v340_v12 = vpop.permute.xlu1 %339 }
 0x4b1   : > { %v345_v13 = vsel %vm231_vm3, %v340_v12, 0 }
 0x4b2   : > { %750 = vmatpush3.bf16.msra.mxu0 %v345_v13 }
 0x4b3   : > { %761 = vmatprep.subr.bf16.mxu0 %v828_v0 }
 0x4b7   : > { %v815_v14 = vpop.eup %814 }
 0x4b8   : > { %v337_v15 = vmul.f32 %v815_v14, %v809_v61 }
 0x4ba   : > { %v338_v16 = vpack.c.bf16 %v337_v15, %v337_v15 }
 0x4bc   : > { %752 = vmatmul.mubr.msk.bf16.vlgmr.msra.gmra.mrb[4].mxu0 %vm164_vm1, %v338_v16  ;;  %v559_v17 = vpop.xlane.xlu0 %558 }
 0x4bd   : > { %763 = vmatprep.mubr.msk.bf16.mxu0 %vm829_vm0, %v828_v0 }
 0x4c0   : > { %v452_v18 = vpop.permute.xlu0 %451 }
 0x4c1   : > { %v457_v2 = vsel %vm231_vm3, %v452_v18, 0 }
 0x4c2   : > { %762 = vmatpush3.bf16.msra.mxu0 %v457_v2 }
 0x4c3   : > { %773 = vmatprep.subr.bf16.mxu0 %v828_v0 }
 0x4e1   : > { %v447_v19 = vpop.xlane.xlu1 %446 }
 0x4e2   : > { %816 = vrcp.f32 %v447_v19 }
 0x4e3   : > { %818 = vrcp.f32 %v559_v17 }
 0x4e5   : > { %v564_v21 = vpop.permute.xlu1 %563 }
 0x4e6   : > { %v569_v23 = vsel %vm231_vm3, %v564_v21, 0 }
 0x4ec   : > { %v817_v20 = vpop.eup %816 }
 0x4ed   : > { %v449_v22 = vmul.f32 %v817_v20, %v813_v9  ;;  %v819_v25 = vpop.eup %818 }
 0x4ee   : > { %v561_v26 = vmul.f32 %v819_v25, %v811_v4 }
 0x4ef   : > { %v450_v24 = vpack.c.bf16 %v449_v22, %v449_v22 }
 0x4f0   : > { %v562_v27 = vpack.c.bf16 %v561_v26, %v561_v26 }
 0x4f1   : > { %764 = vmatmul.mubr.msk.bf16.vlgmr.msra.gmra.mrb[8].mxu0 %vm164_vm1, %v450_v24 }
 0x4f2   : > { %774 = vmatpush3.bf16.msra.mxu0 %v569_v23  ;;  %775 = vmatprep.mubr.msk.bf16.mxu0 %vm829_vm0, %v828_v0 }
 0x4f9   : > { %776 = vmatmul.mubr.msk.bf16.vlgmr.msra.gmra.mrb[12].mxu0 %vm164_vm1, %v562_v27 }
 0x58f   : > { %v381_v28 = vpop.f32.mrb[4].mxu0 }
 0x590   : > { %612 = vrot.lane.b32.xlu1 %v381_v28, %s841_s30  ;;  %v753_v29 = vpop.f32.mrb[5].mxu0 }
 0x591   : > { %v384_v30 = vpop.f32.mrb[6].mxu0 }
 0x592   : > { %v754_v31 = vpop.f32.mrb[7].mxu0 }
 0x5c4   : > { %v493_v32 = vpop.f32.mrb[8].mxu0 }
 0x5c5   : > { %616 = vrot.lane.b32.xlu0 %v493_v32, %s842_s3  ;;  %v765_v34 = vpop.f32.mrb[9].mxu0 }
 0x5c6   : > { %v496_v35 = vpop.f32.mrb[10].mxu0 }
 0x5c7   : > { %v766_v36 = vpop.f32.mrb[11].mxu0 }
 0x5cc   : > { %v605_v37 = vpop.f32.mrb[12].mxu0 }
 0x5cd   : > { %620 = vrot.lane.b32.xlu1 %v605_v37, %s843_s4  ;;  %v777_v0 = vpop.f32.mrb[13].mxu0 }
 0x5ce   : > { %v608_v38 = vpop.f32.mrb[14].mxu0 }
 0x5cf   : > { %v778_v39 = vpop.f32.mrb[15].mxu0 }
 0x602   : > { %v613_v40 = vpop.permute.xlu1 %612 }
 0x603   : > { %v623_v42 = vsel %vm164_vm1, %v924_v33, %v613_v40 }
 0x637   : > { %v617_v41 = vpop.permute.xlu0 %616 }
 0x638   : > { %v625_v43 = vsel %vm624_vm4, %v623_v42, %v617_v41 }
 0x63f   : > { %v621_v44 = vpop.permute.xlu1 %620 }
 0x640   : > { %v627_v45 = vsel %vm626_vm5, %v625_v43, %v621_v44 }
 0x641   : > { %v628_v46 = vpack.c.bf16 %v627_v45, %v627_v45 }
 0x643   : > { %630 = vst.msk [vmem:[%s155_s7] sm:$0xf] %vm629_vm6, %v628_v46 }
 0x644 PF: > { %s12_s9 = sadd.s32 1, %s826_s9  }
 0x645   : > { %p9_p4 = scmp.ge.s32.totalorder %s12_s9, 4  }
 0x647   :  { %11 = sbr.rel (!%p9_p4) target bundleno = 1 (0x1), region = 61 }

// kernel: decoder_forward.21
= control target key start
LH: loop header
LB: loop body
LE: loop exit
PB: predicated region body
PF: predicated region fallthrough
CT: control target
= control target key end

     0   :  { %vm28_vm0 = vcmask 261120   ;;  %v220_v0 = vmov 0.0   ;;  %vm221_vm1 = vmmov 0   ;;  %vm178_vm2 = vcmask 257024   ;;  %s293_s1 = inlined_call_operand.vmem [shape: bf16[32,32], index: 1, kind: input, shape index: {}]   ;;  %s294_s0 = inlined_call_operand.vmem [shape: bf16[16,32], index: 0, kind: input, shape index: {}]   ;;  %s295_s3 = inlined_call_operand.vmem [shape: bf16[16,32], index: 3, kind: input, shape index: {}]   ;;  %s296_s2 = inlined_call_operand.vmem [shape: f32[1,32], index: 2, kind: input, shape index: {}]   ;;  %s297_s4 = inlined_call_operand.vmem [shape: f32[1,32], index: 4, kind: input, shape index: {}]   ;;  %s298_s5 = inlined_call_operand.vmem [shape: f32[1,32], index: 5, kind: input, shape index: {}]   ;;  %s299_s6 = inlined_call_operand.vmem [shape: bf16[16,32], index: 6, kind: output, shape index: {}]  }
   0x1   :  { %203 = vmatprep.subr.bf16.mxu0 %v220_v0  ;;  %v213_v1 = vld [vmem:[%s293_s1] sm:$0xff]   ;;  %207 = vmatprep.mubr.msk.bf16.mxu0 %vm221_vm1, %v220_v0  ;;  %29 = vst.msk [vmem:[#allocation2] sm:$0xff] %vm28_vm0, %v220_v0  ;;  %30 = vst.msk [vmem:[#allocation2 + $0x8] sm:$0xff] %vm28_vm0, %v220_v0  ;;  %v214_v2 = vld [vmem:[%s293_s1 + $0x8] sm:$0xff]  }
   0x2   :  { %204 = vmatpush3.bf16.msra.mxu0 %v213_v1  ;;  %v215_v3 = vld [vmem:[%s294_s0] sm:$0xff]  }
   0x3   :  { %205 = vmatprep.subr.bf16.mxu0 %v220_v0  ;;  %v197_v12 = vld [vmem:[%s295_s3] sm:$0xff]  }
   0x4   :  { %v189_v13 = vld [vmem:[%s296_s2] ss:$0 sm:$0xff]  ;;  %v198_v14 = vunpack.c.l.bf16 %v197_v12  ;;  %v199_v17 = vunpack.c.h.bf16 %v197_v12 }
   0x5   :  { %v190_v41 = vld [vmem:[%s297_s4] ss:$0 sm:$0xff] }
   0x6   :  { %206 = vmatpush3.bf16.msra.mxu0 %v214_v2  ;;  %v191_v43 = vld [vmem:[%s298_s5] ss:$0 sm:$0xff] }
   0x8   :  { %v31_v4 = vld [vmem:[#allocation2] sm:$0xff]  ;;  %v32_v6 = vld [vmem:[#allocation2 + $0x8] sm:$0xff] }
   0x9   :  { %208 = vmatmul.mubr.msk.bf16.vlgmr.msra.gmra.mrb[0].mxu0 %vm28_vm0, %v215_v3 }
  0xdc   :  { %v94_v5 = vpop.f32.mrb[0].mxu0 }
  0xdd   :  { %v101_v7 = vadd.f32 %v94_v5, %v31_v4  ;;  %v209_v8 = vpop.f32.mrb[1].mxu0 }
  0xde   :  { %v97_v9 = vpop.f32.mrb[2].mxu0 }
  0xdf   :  { %103 = vst.msk [vmem:[#allocation2] sm:$0xff] %vm28_vm0, %v101_v7  ;;  %v102_v10 = vadd.f32 %v97_v9, %v32_v6  ;;  %v210_v11 = vpop.f32.mrb[3].mxu0 }
  0xe1   :  { %104 = vst.msk [vmem:[#allocation2 + $0x8] sm:$0xff] %vm28_vm0, %v102_v10 }
  0xe6   :  { %v108_v15 = vld [vmem:[#allocation2] sm:$0xff] }
  0xe7   :  { %v117_v16 = vadd.f32 %v189_v13, %v108_v15 }
  0xe8   :  { %v109_v18 = vld [vmem:[#allocation2 + $0x8] sm:$0xff] }
  0xe9   :  { %v123_v19 = vadd.f32 %v198_v14, %v117_v16  ;;  %v118_v20 = vadd.f32 %v189_v13, %v109_v18 }
  0xeb   :  { %v125_v21 = vsel %vm28_vm0, %v123_v19, 0.0  ;;  %v124_v22 = vadd.f32 %v199_v17, %v118_v20 }
  0xec   :  { %126 = vadd.xlane.f32.xlu0 %v125_v21 }
  0xed   :  { %v128_v23 = vsel %vm28_vm0, %v124_v22, 0.0 }
  0xf0   :  { %129 = vadd.xlane.f32.xlu0 %v128_v23 }
 0x179   :  { %v127_v24 = vpop.xlane.xlu0 %126 }
 0x17a   :  { %v132_v25 = vmul.f32 0.03125, %v127_v24 }
 0x17c   :  { %v134_v26 = vsub.f32 %v123_v19, %v132_v25 }
 0x17d   :  { %v130_v27 = vpop.xlane.xlu0 %129 }
 0x17e   :  { %v133_v28 = vmul.f32 0.03125, %v130_v27  ;;  %v136_v29 = vmul.f32 %v134_v26, %v134_v26 }
 0x180   :  { %v135_v30 = vsub.f32 %v124_v22, %v133_v28  ;;  %v138_v31 = vsel %vm28_vm0, %v136_v29, 0.0 }
 0x181   :  { %139 = vadd.xlane.f32.xlu1 %v138_v31 }
 0x182   :  { %v137_v32 = vmul.f32 %v135_v30, %v135_v30 }
 0x184   :  { %v141_v33 = vsel %vm28_vm0, %v137_v32, 0.0 }
 0x185   :  { %142 = vadd.xlane.f32.xlu1 %v141_v33 }
 0x20e   :  { %v140_v34 = vpop.xlane.xlu1 %139 }
 0x20f   :  { %v144_v35 = vmul.f32 0.03125, %v140_v34 }
 0x211   :  { %v146_v36 = vadd.f32 1e-12, %v144_v35 }
 0x212   :  { %v143_v37 = vpop.xlane.xlu1 %142 }
 0x213   :  { %216 = vrsqrt.f32 %v146_v36  ;;  %v145_v38 = vmul.f32 0.03125, %v143_v37 }
 0x215   :  { %v147_v39 = vadd.f32 1e-12, %v145_v38 }
 0x217   :  { %218 = vrsqrt.f32 %v147_v39 }
 0x21d   :  { %v217_v40 = vpop.eup %216 }
 0x21e   :  { %v150_v42 = vmul.f32 %v217_v40, %v134_v26 }
 0x220   :  { %v159_v44 = vmul.f32 %v190_v41, %v150_v42 }
 0x221   :  { %v219_v45 = vpop.eup %218 }
 0x222   :  { %v168_v46 = vadd.f32 %v191_v43, %v159_v44  ;;  %v151_v47 = vmul.f32 %v219_v45, %v135_v30 }
 0x224   :  { %v194_v48 = vpack.c.bf16 %v168_v46, %v168_v46  ;;  %v160_v49 = vmul.f32 %v190_v41, %v151_v47 }
 0x226   :  { %179 = vst.msk [vmem:[%s299_s6] sm:$0xf] %vm178_vm2, %v194_v48  ;;  %v169_v50 = vadd.f32 %v191_v43, %v160_v49 }
 0x228   :  { %v195_v51 = vpack.c.bf16 %v169_v50, %v169_v50 }
 0x22a   :  { %180 = vst.msk [vmem:[%s299_s6 + $0x4] sm:$0xf] %vm178_vm2, %v195_v51 }

// kernel: decoder_forward.22
= control target key start
LH: loop header
LB: loop body
LE: loop exit
PB: predicated region body
PF: predicated region fallthrough
CT: control target
= control target key end

     0   :  { %vm19_vm0 = vcmask 261120   ;;  %v150_v0 = vmov 0.0   ;;  %vm151_vm1 = vmmov 0   ;;  %vm118_vm2 = vcmask 257024   ;;  %s195_s1 = inlined_call_operand.vmem [shape: bf16[32,32], index: 1, kind: input, shape index: {}]   ;;  %s196_s0 = inlined_call_operand.vmem [shape: bf16[16,32], index: 0, kind: input, shape index: {}]   ;;  %s197_s2 = inlined_call_operand.vmem [shape: f32[1,32], index: 2, kind: input, shape index: {}]   ;;  %s198_s3 = inlined_call_operand.vmem [shape: bf16[16,32], index: 3, kind: output, shape index: {}]  }
   0x1   :  { %137 = vmatprep.subr.bf16.mxu0 %v150_v0  ;;  %v147_v1 = vld [vmem:[%s195_s1] sm:$0xff]   ;;  %141 = vmatprep.mubr.msk.bf16.mxu0 %vm151_vm1, %v150_v0  ;;  %20 = vst.msk [vmem:[#allocation2] sm:$0xff] %vm19_vm0, %v150_v0  ;;  %21 = vst.msk [vmem:[#allocation2 + $0x8] sm:$0xff] %vm19_vm0, %v150_v0  ;;  %v148_v2 = vld [vmem:[%s195_s1 + $0x8] sm:$0xff]  }
   0x2   :  { %138 = vmatpush3.bf16.msra.mxu0 %v147_v1  ;;  %v149_v3 = vld [vmem:[%s196_s0] sm:$0xff]  }
   0x3   :  { %139 = vmatprep.subr.bf16.mxu0 %v150_v0  ;;  %v129_v12 = vld [vmem:[%s197_s2] ss:$0 sm:$0xff] }
   0x6   :  { %140 = vmatpush3.bf16.msra.mxu0 %v148_v2 }
   0x8   :  { %v22_v4 = vld [vmem:[#allocation2] sm:$0xff]  ;;  %v23_v6 = vld [vmem:[#allocation2 + $0x8] sm:$0xff] }
   0x9   :  { %142 = vmatmul.mubr.msk.bf16.vlgmr.msra.gmra.mrb[0].mxu0 %vm19_vm0, %v149_v3 }
  0xdc   :  { %v85_v5 = vpop.f32.mrb[0].mxu0 }
  0xdd   :  { %v92_v7 = vadd.f32 %v85_v5, %v22_v4  ;;  %v143_v8 = vpop.f32.mrb[1].mxu0 }
  0xde   :  { %v88_v9 = vpop.f32.mrb[2].mxu0 }
  0xdf   :  { %94 = vst.msk [vmem:[#allocation2] sm:$0xff] %vm19_vm0, %v92_v7  ;;  %v93_v10 = vadd.f32 %v88_v9, %v23_v6  ;;  %v144_v11 = vpop.f32.mrb[3].mxu0 }
  0xe1   :  { %95 = vst.msk [vmem:[#allocation2 + $0x8] sm:$0xff] %vm19_vm0, %v93_v10 }
  0xe6   :  { %v99_v13 = vld [vmem:[#allocation2] sm:$0xff] }
  0xe7   :  { %v108_v14 = vadd.f32 %v129_v12, %v99_v13 }
  0xe8   :  { %v100_v15 = vld [vmem:[#allocation2 + $0x8] sm:$0xff] }
  0xe9   :  { %v132_v16 = vpack.c.bf16 %v108_v14, %v108_v14  ;;  %v109_v17 = vadd.f32 %v129_v12, %v100_v15 }
  0xeb   :  { %119 = vst.msk [vmem:[%s198_s3] sm:$0xf] %vm118_vm2, %v132_v16  ;;  %v133_v18 = vpack.c.bf16 %v109_v17, %v109_v17 }
  0xed   :  { %120 = vst.msk [vmem:[%s198_s3 + $0x4] sm:$0xf] %vm118_vm2, %v133_v18 }

// kernel: decoder_forward.23
= control target key start
LH: loop header
LB: loop body
LE: loop exit
PB: predicated region body
PF: predicated region fallthrough
CT: control target
= control target key end

     0   :  { %vm19_vm0 = vcmask 523264   ;;  %v151_v0 = vmov 0.0   ;;  %vm152_vm1 = vmmov 0   ;;  %vm47_vm2 = vcmask 261120   ;;  %s195_s1 = inlined_call_operand.vmem [shape: bf16[32,64], index: 1, kind: input, shape index: {}]   ;;  %s196_s0 = inlined_call_operand.vmem [shape: bf16[16,32], index: 0, kind: input, shape index: {}]   ;;  %s197_s2 = inlined_call_operand.vmem [shape: f32[1,64], index: 2, kind: input, shape index: {}]   ;;  %s198_s3 = inlined_call_operand.vmem [shape: bf16[16,64], index: 3, kind: output, shape index: {}]  }
   0x1   :  { %138 = vmatprep.subr.bf16.mxu0 %v151_v0  ;;  %v148_v1 = vld [vmem:[%s195_s1] sm:$0xff]   ;;  %142 = vmatprep.mubr.msk.bf16.mxu0 %vm152_vm1, %v151_v0  ;;  %20 = vst.msk [vmem:[#allocation2] sm:$0xff] %vm19_vm0, %v151_v0  ;;  %21 = vst.msk [vmem:[#allocation2 + $0x8] sm:$0xff] %vm19_vm0, %v151_v0  ;;  %v149_v2 = vld [vmem:[%s195_s1 + $0x8] sm:$0xff]   ;;  %vm119_vm3 = vcmask 519168  }
   0x2   :  { %139 = vmatpush3.bf16.msra.mxu0 %v148_v1  ;;  %v150_v3 = vld [vmem:[%s196_s0] sm:$0xff]  }
   0x3   :  { %140 = vmatprep.subr.bf16.mxu0 %v151_v0  ;;  %v130_v12 = vld [vmem:[%s197_s2] ss:$0 sm:$0xff] }
   0x6   :  { %141 = vmatpush3.bf16.msra.mxu0 %v149_v2 }
   0x8   :  { %v22_v4 = vld [vmem:[#allocation2] sm:$0xff]  ;;  %v23_v6 = vld [vmem:[#allocation2 + $0x8] sm:$0xff] }
   0x9   :  { %143 = vmatmul.mubr.msk.bf16.vlgmr.msra.gmra.mrb[0].mxu0 %vm47_vm2, %v150_v3 }
  0xdc   :  { %v85_v5 = vpop.f32.mrb[0].mxu0 }
  0xdd   :  { %v92_v7 = vadd.f32 %v85_v5, %v22_v4  ;;  %v144_v8 = vpop.f32.mrb[1].mxu0 }
  0xde   :  { %v88_v9 = vpop.f32.mrb[2].mxu0 }
  0xdf   :  { %95 = vst.msk [vmem:[#allocation2] sm:$0xff] %vm19_vm0, %v92_v7  ;;  %v93_v10 = vadd.f32 %v88_v9, %v23_v6  ;;  %v145_v11 = vpop.f32.mrb[3].mxu0 }
  0xe1   :  { %96 = vst.msk [vmem:[#allocation2 + $0x8] sm:$0xff] %vm19_vm0, %v93_v10 }
  0xe6   :  { %v100_v13 = vld [vmem:[#allocation2] sm:$0xff] }
  0xe7   :  { %v109_v14 = vadd.f32 %v130_v12, %v100_v13 }
  0xe8   :  { %v101_v15 = vld [vmem:[#allocation2 + $0x8] sm:$0xff] }
  0xe9   :  { %v133_v16 = vpack.c.bf16 %v109_v14, %v109_v14  ;;  %v110_v17 = vadd.f32 %v130_v12, %v101_v15 }
  0xeb   :  { %120 = vst.msk [vmem:[%s198_s3] sm:$0xf] %vm119_vm3, %v133_v16  ;;  %v134_v18 = vpack.c.bf16 %v110_v17, %v110_v17 }
  0xed   :  { %121 = vst.msk [vmem:[%s198_s3 + $0x4] sm:$0xf] %vm119_vm3, %v134_v18 }

// kernel: decoder_forward.26
= control target key start
LH: loop header
LB: loop body
LE: loop exit
PB: predicated region body
PF: predicated region fallthrough
CT: control target
= control target key end

     0   :  { %vm19_vm0 = vcmask 523264   ;;  %v153_v0 = vmov 0.0   ;;  %vm154_vm1 = vmmov 0   ;;  %vm47_vm2 = vcmask 261120   ;;  %s197_s1 = inlined_call_operand.vmem [shape: bf16[32,64], index: 1, kind: input, shape index: {}]   ;;  %s198_s0 = inlined_call_operand.vmem [shape: bf16[16,32], index: 0, kind: input, shape index: {}]   ;;  %s199_s2 = inlined_call_operand.vmem [shape: f32[1,64], index: 2, kind: input, shape index: {}]   ;;  %s200_s3 = inlined_call_operand.vmem [shape: bf16[16,64], index: 3, kind: output, shape index: {}]  }
   0x1   :  { %140 = vmatprep.subr.bf16.mxu0 %v153_v0  ;;  %v150_v1 = vld [vmem:[%s197_s1] sm:$0xff]   ;;  %144 = vmatprep.mubr.msk.bf16.mxu0 %vm154_vm1, %v153_v0  ;;  %20 = vst.msk [vmem:[#allocation2] sm:$0xff] %vm19_vm0, %v153_v0  ;;  %21 = vst.msk [vmem:[#allocation2 + $0x8] sm:$0xff] %vm19_vm0, %v153_v0  ;;  %v151_v2 = vld [vmem:[%s197_s1 + $0x8] sm:$0xff]   ;;  %vm121_vm3 = vcmask 519168  }
   0x2   :  { %141 = vmatpush3.bf16.msra.mxu0 %v150_v1  ;;  %v152_v3 = vld [vmem:[%s198_s0] sm:$0xff]  }
   0x3   :  { %142 = vmatprep.subr.bf16.mxu0 %v153_v0  ;;  %v132_v12 = vld [vmem:[%s199_s2] ss:$0 sm:$0xff] }
   0x6   :  { %143 = vmatpush3.bf16.msra.mxu0 %v151_v2 }
   0x8   :  { %v22_v4 = vld [vmem:[#allocation2] sm:$0xff]  ;;  %v23_v6 = vld [vmem:[#allocation2 + $0x8] sm:$0xff] }
   0x9   :  { %145 = vmatmul.mubr.msk.bf16.vlgmr.msra.gmra.mrb[0].mxu0 %vm47_vm2, %v152_v3 }
  0xdc   :  { %v85_v5 = vpop.f32.mrb[0].mxu0 }
  0xdd   :  { %v92_v7 = vadd.f32 %v85_v5, %v22_v4  ;;  %v146_v8 = vpop.f32.mrb[1].mxu0 }
  0xde   :  { %v88_v9 = vpop.f32.mrb[2].mxu0 }
  0xdf   :  { %95 = vst.msk [vmem:[#allocation2] sm:$0xff] %vm19_vm0, %v92_v7  ;;  %v93_v10 = vadd.f32 %v88_v9, %v23_v6  ;;  %v147_v11 = vpop.f32.mrb[3].mxu0 }
  0xe1   :  { %96 = vst.msk [vmem:[#allocation2 + $0x8] sm:$0xff] %vm19_vm0, %v93_v10 }
  0xe6   :  { %v100_v13 = vld [vmem:[#allocation2] sm:$0xff] }
  0xe7   :  { %v109_v14 = vadd.f32 %v132_v12, %v100_v13 }
  0xe8   :  { %v101_v15 = vld [vmem:[#allocation2 + $0x8] sm:$0xff] }
  0xe9   :  { %v111_v16 = vmax.f32 %v109_v14, 0.0  ;;  %v110_v17 = vadd.f32 %v132_v12, %v101_v15 }
  0xeb   :  { %v135_v18 = vpack.c.bf16 %v111_v16, %v111_v16  ;;  %v112_v19 = vmax.f32 %v110_v17, 0.0 }
  0xed   :  { %122 = vst.msk [vmem:[%s200_s3] sm:$0xf] %vm121_vm3, %v135_v18  ;;  %v136_v20 = vpack.c.bf16 %v112_v19, %v112_v19 }
  0xef   :  { %123 = vst.msk [vmem:[%s200_s3 + $0x4] sm:$0xf] %vm121_vm3, %v136_v20 }

// kernel: decoder_forward.27
= control target key start
LH: loop header
LB: loop body
LE: loop exit
PB: predicated region body
PF: predicated region fallthrough
CT: control target
= control target key end

     0   :  { %vm28_vm0 = vcmask 261120   ;;  %v247_v0 = vmov 0.0   ;;  %vm248_vm1 = vmmov 0   ;;  %vm72_vm2 = vcmask 523264   ;;  %s325_s1 = inlined_call_operand.vmem [shape: bf16[64,32], index: 1, kind: input, shape index: {}]   ;;  %s326_s0 = inlined_call_operand.vmem [shape: bf16[16,64], index: 0, kind: input, shape index: {}]   ;;  %s327_s3 = inlined_call_operand.vmem [shape: bf16[16,32], index: 3, kind: input, shape index: {}]   ;;  %s328_s2 = inlined_call_operand.vmem [shape: f32[1,32], index: 2, kind: input, shape index: {}]   ;;  %s329_s4 = inlined_call_operand.vmem [shape: f32[1,32], index: 4, kind: input, shape index: {}]   ;;  %s330_s5 = inlined_call_operand.vmem [shape: f32[1,32], index: 5, kind: input, shape index: {}]   ;;  %s331_s6 = inlined_call_operand.vmem [shape: bf16[16,32], index: 6, kind: output, shape index: {}]  }
   0x1   :  { %224 = vmatprep.subr.bf16.mxu0 %v247_v0  ;;  %v238_v1 = vld [vmem:[%s325_s1] sm:$0xff]   ;;  %232 = vmatprep.mubr.msk.bf16.mxu0 %vm248_vm1, %v247_v0  ;;  %29 = vst.msk [vmem:[#allocation2] sm:$0xff] %vm28_vm0, %v247_v0  ;;  %30 = vst.msk [vmem:[#allocation2 + $0x8] sm:$0xff] %vm28_vm0, %v247_v0  ;;  %v239_v2 = vld [vmem:[%s325_s1 + $0x8] sm:$0xff]   ;;  %vm195_vm3 = vcmask 257024  }
   0x2   :  { %225 = vmatpush3.bf16.msra.mxu0 %v238_v1  ;;  %v240_v3 = vld [vmem:[%s325_s1 + $0x10] sm:$0xff]   ;;  %v241_v4 = vld [vmem:[%s325_s1 + $0x18] sm:$0xff]   ;;  %v242_v5 = vld [vmem:[%s326_s0] sm:$0xff]  }
   0x3   :  { %226 = vmatprep.subr.bf16.mxu0 %v247_v0  ;;  %v216_v14 = vld [vmem:[%s327_s3] sm:$0xff]  }
   0x4   :  { %v208_v15 = vld [vmem:[%s328_s2] ss:$0 sm:$0xff]  ;;  %v217_v16 = vunpack.c.l.bf16 %v216_v14  ;;  %v218_v19 = vunpack.c.h.bf16 %v216_v14 }
   0x5   :  { %v209_v43 = vld [vmem:[%s329_s4] ss:$0 sm:$0xff] }
   0x6   :  { %227 = vmatpush3.bf16.msra.mxu0 %v239_v2  ;;  %v210_v45 = vld [vmem:[%s330_s5] ss:$0 sm:$0xff] }
   0x7   :  { %228 = vmatprep.subr.bf16.mxu0 %v247_v0 }
   0x8   :  { %v31_v6 = vld [vmem:[#allocation2] sm:$0xff]  ;;  %v32_v8 = vld [vmem:[#allocation2 + $0x8] sm:$0xff] }
   0xa   :  { %229 = vmatpush3.bf16.msra.mxu0 %v240_v3 }
   0xb   :  { %230 = vmatprep.subr.bf16.mxu0 %v247_v0 }
   0xe   :  { %231 = vmatpush3.bf16.msra.mxu0 %v241_v4 }
  0x11   :  { %233 = vmatmul.mubr.msk.bf16.vlgmr.msra.gmra.mrb[0].mxu0 %vm72_vm2, %v242_v5 }
  0xe4   :  { %v110_v7 = vpop.f32.mrb[0].mxu0 }
  0xe5   :  { %v117_v9 = vadd.f32 %v110_v7, %v31_v6  ;;  %v234_v10 = vpop.f32.mrb[1].mxu0 }
  0xe6   :  { %v113_v11 = vpop.f32.mrb[2].mxu0 }
  0xe7   :  { %120 = vst.msk [vmem:[#allocation2] sm:$0xff] %vm28_vm0, %v117_v9  ;;  %v118_v12 = vadd.f32 %v113_v11, %v32_v8  ;;  %v235_v13 = vpop.f32.mrb[3].mxu0 }
  0xe9   :  { %121 = vst.msk [vmem:[#allocation2 + $0x8] sm:$0xff] %vm28_vm0, %v118_v12 }
  0xee   :  { %v125_v17 = vld [vmem:[#allocation2] sm:$0xff] }
  0xef   :  { %v134_v18 = vadd.f32 %v208_v15, %v125_v17 }
  0xf0   :  { %v126_v20 = vld [vmem:[#allocation2 + $0x8] sm:$0xff] }
  0xf1   :  { %v140_v21 = vadd.f32 %v217_v16, %v134_v18  ;;  %v135_v22 = vadd.f32 %v208_v15, %v126_v20 }
  0xf3   :  { %v142_v23 = vsel %vm28_vm0, %v140_v21, 0.0  ;;  %v141_v24 = vadd.f32 %v218_v19, %v135_v22 }
  0xf4   :  { %143 = vadd.xlane.f32.xlu0 %v142_v23 }
  0xf5   :  { %v145_v25 = vsel %vm28_vm0, %v141_v24, 0.0 }
  0xf8   :  { %146 = vadd.xlane.f32.xlu0 %v145_v25 }
 0x181   :  { %v144_v26 = vpop.xlane.xlu0 %143 }
 0x182   :  { %v149_v27 = vmul.f32 0.03125, %v144_v26 }
 0x184   :  { %v151_v28 = vsub.f32 %v140_v21, %v149_v27 }
 0x185   :  { %v147_v29 = vpop.xlane.xlu0 %146 }
 0x186   :  { %v150_v30 = vmul.f32 0.03125, %v147_v29  ;;  %v153_v31 = vmul.f32 %v151_v28, %v151_v28 }
 0x188   :  { %v152_v32 = vsub.f32 %v141_v24, %v150_v30  ;;  %v155_v33 = vsel %vm28_vm0, %v153_v31, 0.0 }
 0x189   :  { %156 = vadd.xlane.f32.xlu1 %v155_v33 }
 0x18a   :  { %v154_v34 = vmul.f32 %v152_v32, %v152_v32 }
 0x18c   :  { %v158_v35 = vsel %vm28_vm0, %v154_v34, 0.0 }
 0x18d   :  { %159 = vadd.xlane.f32.xlu1 %v158_v35 }
 0x216   :  { %v157_v36 = vpop.xlane.xlu1 %156 }
 0x217   :  { %v161_v37 = vmul.f32 0.03125, %v157_v36 }
 0x219   :  { %v163_v38 = vadd.f32 1e-12, %v161_v37 }
 0x21a   :  { %v160_v39 = vpop.xlane.xlu1 %159 }
 0x21b   :  { %243 = vrsqrt.f32 %v163_v38  ;;  %v162_v40 = vmul.f32 0.03125, %v160_v39 }
 0x21d   :  { %v164_v41 = vadd.f32 1e-12, %v162_v40 }
 0x21f   :  { %245 = vrsqrt.f32 %v164_v41 }
 0x225   :  { %v244_v42 = vpop.eup %243 }
 0x226   :  { %v167_v44 = vmul.f32 %v244_v42, %v151_v28 }
 0x228   :  { %v176_v46 = vmul.f32 %v209_v43, %v167_v44 }
 0x229   :  { %v246_v47 = vpop.eup %245 }
 0x22a   :  { %v185_v48 = vadd.f32 %v210_v45, %v176_v46  ;;  %v168_v49 = vmul.f32 %v246_v47, %v152_v32 }
 0x22c   :  { %v213_v50 = vpack.c.bf16 %v185_v48, %v185_v48  ;;  %v177_v51 = vmul.f32 %v209_v43, %v168_v49 }
 0x22e   :  { %196 = vst.msk [vmem:[%s331_s6] sm:$0xf] %vm195_vm3, %v213_v50  ;;  %v186_v52 = vadd.f32 %v210_v45, %v177_v51 }
 0x230   :  { %v214_v53 = vpack.c.bf16 %v186_v52, %v186_v52 }
 0x232   :  { %197 = vst.msk [vmem:[%s331_s6 + $0x4] sm:$0xf] %vm195_vm3, %v214_v53 }

// kernel: decoder_forward.24
= control target key start
LH: loop header
LB: loop body
LE: loop exit
PB: predicated region body
PF: predicated region fallthrough
CT: control target
= control target key end

     0   :  { %s917_s12 = smov 0   ;;  %s1017_s0 = inlined_call_operand.vmem [shape: bf16[2,8,32], index: 0, kind: input, shape index: {}]   ;;  %s1018_s1 = inlined_call_operand.vmem [shape: bf16[2,8,64], index: 1, kind: input, shape index: {}]   ;;  %s1019_s2 = inlined_call_operand.vmem [shape: f32[2,8,8], index: 2, kind: input, shape index: {}]   ;;  %s1020_s3 = inlined_call_operand.vmem [shape: bf16[2,8,32], index: 3, kind: output, shape index: {}]  }
   0x1 LB: > { %s754_s13 = sadd.s32 4294967295, %s883_s12   ;;  %p758_p0 = scmp.ge.s32.totalorder %s883_s12, 1  ;;  %s883_s12 = sphi %s917_s12, %s13_s12  }
   0x2   : > { %p154_p1 = scmp.lt.s32.totalorder %s883_s12, 3 }
   0x4   : > { %p155_p2 = pnand %p758_p0, %p154_p1 }
   0x5   : > { %p184_p3 = scmp.lt.s32.totalorder (!%p155_p2), %s754_s13, 1  ;;  %v885_v0 = vmov (!%p155_p2), 0.0   ;;  %vm886_vm0 = vmmov (!%p155_p2), 0   ;;  %vm204_vm1 = vcmask (!%p155_p2), 64512   ;;  %s887_s25 = smov (!%p155_p2), 96   ;;  %vm274_vm3 = vcmask (!%p155_p2), 1043456  }
   0x6   : > { %158 = sbr.rel (%p155_p2) target bundleno = 1443 (0x5a3), region = 32  ;;  %791 = vmatprep.subr.bf16.mxu0 (!%p155_p2), %v885_v0  ;;  %793 = vmatprep.mubr.msk.bf16.mxu0 (!%p155_p2), %vm886_vm0, %v885_v0  ;;  %s888_s26 = smov (!%p155_p2), 120   ;;  %vm670_vm4 = vcmask (!%p155_p2), 130048   ;;  %vm672_vm5 = vcmask (!%p155_p2), 195584   ;;  %vm675_vm6 = vcmask (!%p155_p2), 257024  }
   0x7   : > { %797 = vmatprep.subr.bf16.mxu1 (!%p155_p2), %v885_v0  ;;  %799 = vmatprep.mubr.msk.bf16.mxu1 (!%p155_p2), %vm886_vm0, %v885_v0  ;;  %s889_s27 = smov (!%p155_p2), 112   ;;  %s890_s28 = smov (!%p155_p2), 104  }
   0x8   : > { %s891_s29 = smov (!%p155_p2), 88   ;;  %s892_s30 = smov (!%p155_p2), 72  }
   0x9   : > { %s893_s4 = smov (!%p155_p2), 80   ;;  %s894_s5 = smov (!%p155_p2), 8  }
   0xa   : > { %s895_s6 = smov (!%p155_p2), 16   ;;  %s896_s7 = smov (!%p155_p2), 24  }
   0xd   : > { %s1022_s13 = smov (!%p184_p3, %s754_s13), 1 }
   0xe   : > { %s931_s14 = sshll.u32 %s1022_s13, 2  ;;  %s761_s21 = sshll.u32 %s1022_s13, 3 }
   0xf   : > { %s191_s17 = scalar_lea.vmem %s1018_s1, %s931_s14  ;;  %s187_s20 = scalar_lea.vmem %s1017_s0, %s931_s14 }
  0x10   : > { %v201_v1 = vld [vmem:[%s191_s17] sm:$0xf]  ;;  %s195_s24 = scalar_lea.vmem %s1019_s2, %s761_s21  ;;  %s199_s10 = scalar_lea.vmem %s1020_s3, %s931_s14 }
  0x11   : > { %v209_v2 = vsel %vm204_vm1, %v201_v1, 0  ;;  %v202_v3 = vld [vmem:[%s187_s20] sm:$0xf]  ;;  %v955_v12 = vcombine.low %v201_v1, %v201_v1 }
  0x12   : > { %792 = vmatpush3.bf16.xpose.msra.mxu0 %v209_v2  ;;  %v949_v4 = vld [vmem:[%s195_s24] sm:$0xff]  ;;  %v766_v13 = vcombine.low %v202_v3, %v202_v3 }
  0x13   : > { %809 = vmatprep.subr.bf16.mxu0 %v885_v0  ;;  %vm252_vm2 = vcmp.eq.f32.partialorder %v949_v4, 0.0  ;;  %269 = vrot.lane.b32.xlu1 %v955_v12, %s887_s25 }
  0x17   : > { %323 = vrot.lane.b32.xlu1 %v955_v12, %s888_s26 }
  0x19   : > { %794 = vmatmul.mubr.msk.bf16.vlgmr.msra.gmra.mrb[0].mxu0 %vm204_vm1, %v202_v3 }
  0x1a   : > { %811 = vmatprep.mubr.msk.bf16.mxu0 %vm886_vm0, %v885_v0 }
  0x1b   : > { %435 = vrot.lane.b32.xlu1 %v955_v12, %s889_s27 }
  0x1f   : > { %433 = vrot.lane.b32.xlu1 %v766_v13, %s889_s27 }
  0x23   : > { %547 = vrot.lane.b32.xlu1 %v955_v12, %s890_s28 }
  0x27   : > { %545 = vrot.lane.b32.xlu1 %v766_v13, %s890_s28 }
  0x85   : > { %v270_v19 = vpop.permute.xlu1 %269 }
  0x86   : > { %v276_v20 = vsel %vm274_vm3, %v270_v19, 0 }
  0x87   : > { %798 = vmatpush3.bf16.msra.mxu1 %v276_v20 }
  0x88   : > { %803 = vmatprep.subr.bf16.mxu1 %v885_v0 }
  0x89   : > { %v324_v23 = vpop.permute.xlu1 %323 }
  0x8a   : > { %v329_v25 = vsel %vm204_vm1, %v324_v23, 0 }
  0x8d   : > { %v436_v27 = vpop.permute.xlu1 %435 }
  0x8e   : > { %v441_v30 = vsel %vm204_vm1, %v436_v27, 0 }
  0x91   : > { %v434_v29 = vpop.permute.xlu1 %433 }
  0x95   : > { %v548_v31 = vpop.permute.xlu1 %547 }
  0x96   : > { %v553_v32 = vsel %vm204_vm1, %v548_v31, 0 }
  0x99   : > { %v546_v33 = vpop.permute.xlu1 %545 }
  0xec   : > { %v245_v5 = vpop.f32.mrb[0].mxu0 }
  0xed   : > { %v251_v6 = vmul.f32 0.35355338, %v245_v5  ;;  %v795_v7 = vpop.f32.mrb[1].mxu0 }
  0xee   : > { %v248_v8 = vpop.f32.mrb[2].mxu0 }
  0xef   : > { %v796_v9 = vpop.f32.mrb[3].mxu0  ;;  %v253_v10 = vsel %vm252_vm2, -10000.0, %v251_v6 }
  0xf0   : > { %v254_v11 = vsel %vm204_vm1, %v253_v10, -inf }
  0xf1   : > { %255 = vmax.xlane.f32.xlu0 %v254_v11 }
 0x17e   : > { %v256_v14 = vpop.xlane.xlu0 %255 }
 0x17f   : > { %v257_v15 = vsub.f32 %v253_v10, %v256_v14 }
 0x181   : > { %v258_v16 = vmul.f32 1.442695, %v257_v15 }
 0x183   : > { %861 = vpow2.f32 %v258_v16 }
 0x18d   : > { %v862_v17 = vpop.eup %861 }
 0x18e   : > { %v260_v18 = vsel %vm204_vm1, %v862_v17, 0.0 }
 0x18f   : > { %261 = vadd.xlane.f32.xlu0 %v260_v18 }
 0x1a5   : > { %321 = vrot.lane.b32.xlu0 %v766_v13, %s888_s26 }
 0x21c   : > { %v262_v21 = vpop.xlane.xlu0 %261 }
 0x21d   : > { %863 = vrcp.f32 %v262_v21 }
 0x220   : > { %v322_v28 = vpop.permute.xlu0 %321 }
 0x227   : > { %v864_v22 = vpop.eup %863 }
 0x228   : > { %v264_v24 = vmul.f32 %v864_v22, %v862_v17 }
 0x22a   : > { %v265_v26 = vpack.c.bf16 %v264_v24, %v264_v24 }
 0x22c   : > { %800 = vmatmul.mubr.msk.bf16.vlgmr.msra.gmra.mrb[0].mxu1 %vm204_vm1, %v265_v26 }
 0x22d   : > { %804 = vmatpush3.bf16.xpose.msra.mxu1 %v329_v25  ;;  %805 = vmatprep.mubr.msk.bf16.mxu1 %vm886_vm0, %v885_v0 }
 0x22e   : > { %815 = vmatprep.subr.bf16.mxu1 %v885_v0 }
 0x234   : > { %806 = vmatmul.mubr.msk.bf16.vlgmr.msra.gmra.mrb[4].mxu1 %vm204_vm1, %v322_v28 }
 0x235   : > { %816 = vmatpush3.bf16.xpose.msra.mxu1 %v441_v30  ;;  %817 = vmatprep.mubr.msk.bf16.mxu1 %vm886_vm0, %v885_v0 }
 0x236   : > { %827 = vmatprep.subr.bf16.mxu1 %v885_v0 }
 0x23c   : > { %818 = vmatmul.mubr.msk.bf16.vlgmr.msra.gmra.mrb[8].mxu1 %vm204_vm1, %v434_v29 }
 0x23d   : > { %828 = vmatpush3.bf16.xpose.msra.mxu1 %v553_v32  ;;  %829 = vmatprep.mubr.msk.bf16.mxu1 %vm886_vm0, %v885_v0 }
 0x244   : > { %830 = vmatmul.mubr.msk.bf16.vlgmr.msra.gmra.mrb[12].mxu1 %vm204_vm1, %v546_v33 }
 0x2ff   : > { %v979_v34 = vpop.f32.mrb[0].mxu1 }
 0x300   : > { %v801_v35 = vpop.f32.mrb[1].mxu1 }
 0x301   : > { %v315_v36 = vpop.f32.mrb[2].mxu1 }
 0x302   : > { %v802_v37 = vpop.f32.mrb[3].mxu1 }
 0x307   : > { %v365_v38 = vpop.f32.mrb[4].mxu1 }
 0x308   : > { %v371_v39 = vmul.f32 0.35355338, %v365_v38  ;;  %v807_v40 = vpop.f32.mrb[5].mxu1 }
 0x309   : > { %v368_v41 = vpop.f32.mrb[6].mxu1 }
 0x30a   : > { %v808_v42 = vpop.f32.mrb[7].mxu1  ;;  %v372_v43 = vsel %vm252_vm2, -10000.0, %v371_v39 }
 0x30b   : > { %v373_v44 = vsel %vm204_vm1, %v372_v43, -inf }
 0x30c   : > { %374 = vmax.xlane.f32.xlu1 %v373_v44 }
 0x30f   : > { %v477_v45 = vpop.f32.mrb[8].mxu1 }
 0x310   : > { %v483_v46 = vmul.f32 0.35355338, %v477_v45  ;;  %v819_v47 = vpop.f32.mrb[9].mxu1 }
 0x311   : > { %v480_v48 = vpop.f32.mrb[10].mxu1 }
 0x312   : > { %v820_v49 = vpop.f32.mrb[11].mxu1  ;;  %v484_v50 = vsel %vm252_vm2, -10000.0, %v483_v46 }
 0x313   : > { %v485_v51 = vsel %vm204_vm1, %v484_v50, -inf }
 0x314   : > { %486 = vmax.xlane.f32.xlu0 %v485_v51 }
 0x317   : > { %v589_v52 = vpop.f32.mrb[12].mxu1 }
 0x318   : > { %v595_v53 = vmul.f32 0.35355338, %v589_v52  ;;  %v831_v54 = vpop.f32.mrb[13].mxu1 }
 0x319   : > { %v592_v55 = vpop.f32.mrb[14].mxu1 }
 0x31a   : > { %v832_v56 = vpop.f32.mrb[15].mxu1  ;;  %v596_v57 = vsel %vm252_vm2, -10000.0, %v595_v53 }
 0x31b   : > { %v597_v58 = vsel %vm204_vm1, %v596_v57, -inf }
 0x31c   : > { %598 = vmax.xlane.f32.xlu1 %v597_v58 }
 0x32d   : > { %385 = vrot.lane.b32.xlu1 %v955_v12, %s891_s29 }
 0x399   : > { %v375_v59 = vpop.xlane.xlu1 %374 }
 0x39a   : > { %v376_v60 = vsub.f32 %v372_v43, %v375_v59 }
 0x39c   : > { %v377_v61 = vmul.f32 1.442695, %v376_v60 }
 0x39e   : > { %865 = vpow2.f32 %v377_v61 }
 0x3a1   : > { %v487_v62 = vpop.xlane.xlu0 %486 }
 0x3a2   : > { %v488_v63 = vsub.f32 %v484_v50, %v487_v62 }
 0x3a4   : > { %v489_v1 = vmul.f32 1.442695, %v488_v63 }
 0x3a6   : > { %867 = vpow2.f32 %v489_v1 }
 0x3a8   : > { %v866_v2 = vpop.eup %865 }
 0x3a9   : > { %v599_v3 = vpop.xlane.xlu1 %598  ;;  %v379_v5 = vsel %vm204_vm1, %v866_v2, 0.0 }
 0x3aa   : > { %v600_v4 = vsub.f32 %v596_v57, %v599_v3  ;;  %380 = vadd.xlane.f32.xlu0 %v379_v5 }
 0x3ac   : > { %v601_v6 = vmul.f32 1.442695, %v600_v4 }
 0x3ad   : > { %v386_v7 = vpop.permute.xlu1 %385 }
 0x3ae   : > { %869 = vpow2.f32 %v601_v6  ;;  %v391_v8 = vsel %vm274_vm3, %v386_v7, 0 }
 0x3af   : > { %810 = vmatpush3.bf16.msra.mxu0 %v391_v8 }
 0x3b0   : > { %v868_v9 = vpop.eup %867  ;;  %821 = vmatprep.subr.bf16.mxu0 %v885_v0 }
 0x3b1   : > { %v491_v10 = vsel %vm204_vm1, %v868_v9, 0.0 }
 0x3b2   : > { %492 = vadd.xlane.f32.xlu1 %v491_v10 }
 0x3b8   : > { %v870_v11 = vpop.eup %869 }
 0x3b9   : > { %v603_v13 = vsel %vm204_vm1, %v870_v11, 0.0 }
 0x3ba   : > { %604 = vadd.xlane.f32.xlu0 %v603_v13 }
 0x3c3   : > { %609 = vrot.lane.b32.xlu1 %v955_v12, %s892_s30 }
 0x3d0   : > { %497 = vrot.lane.b32.xlu0 %v955_v12, %s893_s4 }
 0x437   : > { %v381_v14 = vpop.xlane.xlu0 %380 }
 0x438   : > { %871 = vrcp.f32 %v381_v14 }
 0x43f   : > { %v493_v15 = vpop.xlane.xlu1 %492 }
 0x440   : > { %873 = vrcp.f32 %v493_v15 }
 0x442   : > { %v872_v16 = vpop.eup %871 }
 0x443   : > { %v383_v17 = vmul.f32 %v872_v16, %v866_v2  ;;  %v610_v23 = vpop.permute.xlu1 %609 }
 0x444   : > { %v615_v25 = vsel %vm274_vm3, %v610_v23, 0 }
 0x445   : > { %v384_v18 = vpack.c.bf16 %v383_v17, %v383_v17 }
 0x447   : > { %v605_v19 = vpop.xlane.xlu0 %604  ;;  %812 = vmatmul.mubr.msk.bf16.vlgmr.msra.gmra.mrb[4].mxu0 %vm204_vm1, %v384_v18 }
 0x448   : > { %875 = vrcp.f32 %v605_v19  ;;  %823 = vmatprep.mubr.msk.bf16.mxu0 %vm886_vm0, %v885_v0 }
 0x44a   : > { %v874_v20 = vpop.eup %873 }
 0x44b   : > { %v495_v21 = vmul.f32 %v874_v20, %v868_v9  ;;  %v498_v22 = vpop.permute.xlu0 %497 }
 0x44c   : > { %v503_v12 = vsel %vm274_vm3, %v498_v22, 0 }
 0x44d   : > { %822 = vmatpush3.bf16.msra.mxu0 %v503_v12  ;;  %v496_v24 = vpack.c.bf16 %v495_v21, %v495_v21 }
 0x44e   : > { %833 = vmatprep.subr.bf16.mxu0 %v885_v0 }
 0x450   : > { %824 = vmatmul.mubr.msk.bf16.vlgmr.msra.gmra.mrb[8].mxu0 %vm204_vm1, %v496_v24 }
 0x451   : > { %834 = vmatpush3.bf16.msra.mxu0 %v615_v25  ;;  %835 = vmatprep.mubr.msk.bf16.mxu0 %vm886_vm0, %v885_v0 }
 0x452   : > { %v876_v26 = vpop.eup %875 }
 0x453   : > { %v607_v27 = vmul.f32 %v876_v26, %v870_v11 }
 0x455   : > { %v608_v28 = vpack.c.bf16 %v607_v27, %v607_v27 }
 0x458   : > { %836 = vmatmul.mubr.msk.bf16.vlgmr.msra.gmra.mrb[12].mxu0 %vm204_vm1, %v608_v28 }
 0x51a   : > { %v427_v29 = vpop.f32.mrb[4].mxu0 }
 0x51b   : > { %658 = vrot.lane.b32.xlu1 %v427_v29, %s894_s5  ;;  %v813_v30 = vpop.f32.mrb[5].mxu0 }
 0x51c   : > { %v430_v31 = vpop.f32.mrb[6].mxu0 }
 0x51d   : > { %v814_v32 = vpop.f32.mrb[7].mxu0 }
 0x523   : > { %v539_v33 = vpop.f32.mrb[8].mxu0 }
 0x524   : > { %662 = vrot.lane.b32.xlu0 %v539_v33, %s895_s6  ;;  %v825_v35 = vpop.f32.mrb[9].mxu0 }
 0x525   : > { %v542_v36 = vpop.f32.mrb[10].mxu0 }
 0x526   : > { %v826_v37 = vpop.f32.mrb[11].mxu0 }
 0x52b   : > { %v651_v38 = vpop.f32.mrb[12].mxu0 }
 0x52c   : > { %666 = vrot.lane.b32.xlu1 %v651_v38, %s896_s7  ;;  %v837_v0 = vpop.f32.mrb[13].mxu0 }
 0x52d   : > { %v654_v39 = vpop.f32.mrb[14].mxu0 }
 0x52e   : > { %v838_v40 = vpop.f32.mrb[15].mxu0 }
 0x58d   : > { %v659_v41 = vpop.permute.xlu1 %658 }
 0x58e   : > { %v669_v43 = vsel %vm204_vm1, %v979_v34, %v659_v41 }
 0x596   : > { %v663_v42 = vpop.permute.xlu0 %662 }
 0x597   : > { %v671_v44 = vsel %vm670_vm4, %v669_v43, %v663_v42 }
 0x59e   : > { %v667_v45 = vpop.permute.xlu1 %666 }
 0x59f   : > { %v673_v46 = vsel %vm672_vm5, %v671_v44, %v667_v45 }
 0x5a0   : > { %v674_v47 = vpack.c.bf16 %v673_v46, %v673_v46 }
 0x5a2   : > { %676 = vst.msk [vmem:[%s199_s10] sm:$0xf] %vm675_vm6, %v674_v47 }
 0x5a3 PF: > { %s13_s12 = sadd.s32 1, %s883_s12  }
 0x5a4   : > { %p10_p4 = scmp.ge.s32.totalorder %s13_s12, 4  }
 0x5a6   :  { %12 = sbr.rel (!%p10_p4) target bundleno = 1 (0x1), region = 68 }

// kernel: decoder_forward.37
= control target key start
LH: loop header
LB: loop body
LE: loop exit
PB: predicated region body
PF: predicated region fallthrough
CT: control target
= control target key end

     0   :  { %v136_v0 = vmov 0.0   ;;  %vm137_vm0 = vmmov 0   ;;  %vm46_vm1 = vcmask 261120   ;;  %s176_s1 = inlined_call_operand.vmem [shape: bf16[32,128], index: 1, kind: input, shape index: {}]   ;;  %s177_s0 = inlined_call_operand.vmem [shape: bf16[16,32], index: 0, kind: input, shape index: {}]   ;;  %s178_s2 = inlined_call_operand.vmem [shape: f32[1,128], index: 2, kind: input, shape index: {}]   ;;  %s179_s3 = inlined_call_operand.vmem [shape: f32[16,128], index: 3, kind: output, shape index: {}]  }
   0x1   :  { %123 = vmatprep.subr.bf16.mxu0 %v136_v0  ;;  %v133_v1 = vld [vmem:[%s176_s1] sm:$0xff]   ;;  %127 = vmatprep.mubr.msk.bf16.mxu0 %vm137_vm0, %v136_v0  ;;  %v134_v2 = vld [vmem:[%s176_s1 + $0x8] sm:$0xff]  }
   0x2   :  { %124 = vmatpush3.bf16.msra.mxu0 %v133_v1  ;;  %v135_v3 = vld [vmem:[%s177_s0] sm:$0xff]  }
   0x3   :  { %125 = vmatprep.subr.bf16.mxu0 %v136_v0  ;;  %v119_v4 = vld [vmem:[%s178_s2] ss:$0 sm:$0xff] }
   0x6   :  { %126 = vmatpush3.bf16.msra.mxu0 %v134_v2 }
   0x9   :  { %128 = vmatmul.mubr.msk.bf16.vlgmr.msra.gmra.mrb[0].mxu0 %vm46_vm1, %v135_v3 }
  0xdc   :  { %v84_v5 = vpop.f32.mrb[0].mxu0 }
  0xdd   :  { %v107_v6 = vadd.f32 %v119_v4, %v84_v5  ;;  %v129_v7 = vpop.f32.mrb[1].mxu0 }
  0xde   :  { %v87_v8 = vpop.f32.mrb[2].mxu0 }
  0xdf   :  { %109 = vst [vmem:[%s179_s3] sm:$0xff] %v107_v6  ;;  %v108_v9 = vadd.f32 %v119_v4, %v87_v8  ;;  %v130_v10 = vpop.f32.mrb[3].mxu0 }
  0xe1   :  { %110 = vst [vmem:[%s179_s3 + $0x8] sm:$0xff] %v108_v9 }

</bundles_post_ra>
